<compile_context>
chip_gen: v6e
topology: v6e:2x2x1
jax: 0.10.0
libtpu: 0.0.40
codegen_flags: <defaults>
</compile_context>

<pallas_src>
import functools

import jax
import jax.numpy as jnp
from jax import lax
from jax.experimental import pallas as pl
from jax.experimental.pallas import tpu as pltpu


def _round_up(x, m):
    return ((x + m - 1) // m) * m


# ----------------------------------------------------------------------------
# Kernel: `chunk` RNN steps per grid iteration; full sequence in one launch.
# ----------------------------------------------------------------------------
def _rnn_seq_kernel(x_ref, h0_ref, wxh_ref, whh_ref, b1_ref, who_ref, b2_ref,
                    out_ref, hT_ref, h_scr, *, chunk, t_total):
    ci = pl.program_id(0)

    # Initialize the carried hidden state once, at the first grid step.
    @pl.when(ci == 0)
    def _():
        h_scr[...] = h0_ref[...]

    # Hoist loop-invariant operands (weights / pre-broadcast biases).
    wxh = wxh_ref[...]
    whh = whh_ref[...]
    who = who_ref[...]
    b1 = b1_ref[...]
    b2 = b2_ref[...]

    def step(c, carry):
        t = ci * chunk + c

        @pl.when(t < t_total)           # skip padded tail steps
        def _():
            h = h_scr[...]
            pre = (jnp.dot(x_ref[c], wxh, preferred_element_type=jnp.float32)
                   + jnp.dot(h, whh, preferred_element_type=jnp.float32)
                   + b1)
            h_new = jnp.tanh(pre)                                    # EUP
            out = jnp.dot(h_new, who, preferred_element_type=jnp.float32) + b2
            out_ref[c] = out.astype(out_ref.dtype)                   # lane-dense store
            h_scr[...] = h_new                                       # recurrence (VMEM only)

            @pl.when(t == t_total - 1)                               # hidden leaves VMEM once
            def _():
                hT_ref[...] = h_new.astype(hT_ref.dtype)

        return carry

    lax.fori_loop(0, chunk, step, 0, unroll=True)


# ----------------------------------------------------------------------------
# Wrappers
# ----------------------------------------------------------------------------
def recognition_rnn_sequence(x_seq, h0, prep, *, dims, chunk=8):
    """Run the full recurrence in one fused kernel.

    x_seq: (T, B, obs_dim), h0: (B, nhidden).
    Returns (out: (T, B, 2*latent_dim), h_T: (B, nhidden)), identical to
    applying RecognitionRNN.forward T times.
    """
    T, B, obs_dim = x_seq.shape
    nhidden, out_dim = dims["nhidden"], dims["out_dim"]
    Bp, Kp = prep["b1"].shape[0], prep["wxh"].shape[0]
    Np, Op = prep["whh"].shape[0], prep["who"].shape[1]
    assert B <= Bp and obs_dim <= Kp, "batch / obs_dim larger than prepared padding"

    chunk = max(1, min(chunk, T))
    n_chunks = pl.cdiv(T, chunk)
    Tp = n_chunks * chunk

    f32 = jnp.float32
    # One-time (per call) zero-padding of the dynamic inputs; zeros are exact no-ops.
    x_p = jnp.zeros((Tp, Bp, Kp), f32).at[:T, :B, :obs_dim].set(x_seq.astype(f32))
    h0_p = jnp.zeros((Bp, Np), f32).at[:B, :nhidden].set(h0.astype(f32))

    kernel = functools.partial(_rnn_seq_kernel, chunk=chunk, t_total=T)
    out_p, hT_p = pl.pallas_call(
        kernel,
        grid=(n_chunks,),
        in_specs=[
            pl.BlockSpec((chunk, Bp, Kp), lambda ci: (ci, 0, 0)),  # x: streamed per chunk
            pl.BlockSpec((Bp, Np), lambda ci: (0, 0)),             # h0
            pl.BlockSpec((Kp, Np), lambda ci: (0, 0)),             # wxh  (VMEM-resident)
            pl.BlockSpec((Np, Np), lambda ci: (0, 0)),             # whh  (VMEM-resident)
            pl.BlockSpec((Bp, Np), lambda ci: (0, 0)),             # b1   (VMEM-resident)
            pl.BlockSpec((Np, Op), lambda ci: (0, 0)),             # who  (VMEM-resident)
            pl.BlockSpec((Bp, Op), lambda ci: (0, 0)),             # b2   (VMEM-resident)
        ],
        out_specs=(
            pl.BlockSpec((chunk, Bp, Op), lambda ci: (ci, 0, 0)),  # all per-step outputs
            pl.BlockSpec((Bp, Np), lambda ci: (0, 0)),             # final hidden
        ),
        out_shape=(
            jax.ShapeDtypeStruct((Tp, Bp, Op), f32),
            jax.ShapeDtypeStruct((Bp, Np), f32),
        ),
        scratch_shapes=[pltpu.VMEM((Bp, Np), f32)],                # carried hidden state
        compiler_params=pltpu.CompilerParams(
            dimension_semantics=("arbitrary",)),                   # sequential recurrence
    )(x_p, h0_p, prep["wxh"], prep["whh"], prep["b1"], prep["who"], prep["b2"])

    out = out_p[:T, :B, :out_dim].astype(x_seq.dtype)
    h_T = hT_p[:B, :nhidden].astype(h0.dtype)
    return out, h_T


def recognition_rnn_forward(x, h, prep, *, dims):
    """Single-step API parity with RecognitionRNN.forward(x, h) -> (out, h)."""
    out, h_new = recognition_rnn_sequence(x[None], h, prep, dims=dims, chunk=1)
    return out[0], h_new


# ----------------------------------------------------------------------------
# One-time parameter preparation (hoisted out of the hot path)
# ----------------------------------------------------------------------------
def prepare_params(p, obs_dim, nbatch):
    nhidden = p["w_i2h"].shape[0]
    out_dim = p["w_h2o"].shape[0]
    Bp = _round_up(max(nbatch, 1), 8)       # padded batch (sublanes)
    Kp = _round_up(max(obs_dim, 1), 8)      # padded obs width
    Np = _round_up(nhidden, 128)            # padded hidden width (lanes)
    Op = _round_up(out_dim, 128)            # padded output width (lanes)

    f32 = jnp.float32
    w_i2h = p["w_i2h"].astype(f32)          # (nhidden, obs_dim + nhidden), torch (out, in)
    wx = w_i2h[:, :obs_dim].T               # (obs_dim, nhidden)
    wh = w_i2h[:, obs_dim:].T               # (nhidden, nhidden)
    wo = p["w_h2o"].astype(f32).T           # (nhidden, out_dim)

    prep = {
        "wxh": jnp.zeros((Kp, Np), f32).at[:obs_dim, :nhidden].set(wx),
        "whh": jnp.zeros((Np, Np), f32).at[:nhidden, :nhidden].set(wh),
        "who": jnp.zeros((Np, Op), f32).at[:nhidden, :out_dim].set(wo),
        # Biases pre-broadcast to full (Bp, 128)-tiles: single whole-vreg VPU add in-kernel.
        "b1": jnp.zeros((Bp, Np), f32).at[:, :nhidden].set(
            jnp.broadcast_to(p["b_i2h"].astype(f32), (Bp, nhidden))),
        "b2": jnp.zeros((Bp, Op), f32).at[:, :out_dim].set(
            jnp.broadcast_to(p["b_h2o"].astype(f32), (Bp, out_dim))),
    }
    dims = {"obs_dim": obs_dim, "nhidden": nhidden, "out_dim": out_dim}
    return prep, dims


def init_params(key, latent_dim, obs_dim, nhidden):
    ks = jax.random.split(key, 4)
    s = 0.1
    return {
        "w_i2h": s * jax.random.normal(ks[0], (nhidden, obs_dim + nhidden), jnp.float32),
        "b_i2h": s * jax.random.normal(ks[1], (nhidden,), jnp.float32),
        "w_h2o": s * jax.random.normal(ks[2], (latent_dim * 2, nhidden), jnp.float32),
        "b_h2o": s * jax.random.normal(ks[3], (latent_dim * 2,), jnp.float32),
    }


# ----------------------------------------------------------------------------
# Pure-JAX reference (mirrors the PyTorch forward exactly)
# ----------------------------------------------------------------------------
def reference_forward(x, h, p):
    combined = jnp.concatenate([x, h], axis=1)
    h_new = jnp.tanh(combined @ p["w_i2h"].T + p["b_i2h"])
    out = h_new @ p["w_h2o"].T + p["b_h2o"]
    return out, h_new


if __name__ == "__main__":
    # Module defaults: latent_dim=4, obs_dim=2, nhidden=25; small batch, short sequence.
    latent_dim, obs_dim, nhidden, nbatch = 4, 2, 25, 4
    T, CHUNK = 20, 8          # T not a multiple of CHUNK -> exercises the tail masking

    key = jax.random.PRNGKey(0)
    kx, kp = jax.random.split(key)
    params = init_params(kp, latent_dim, obs_dim, nhidden)
    prep, dims = prepare_params(params, obs_dim=obs_dim, nbatch=nbatch)

    x_seq = jax.random.normal(kx, (T, nbatch, obs_dim), jnp.float32)
    h0 = jnp.zeros((nbatch, nhidden), jnp.float32)        # initHidden()

    # Fused whole-sequence kernel: one pallas_call for all T steps.
    fwd_seq = jax.jit(
        lambda xs, h, p: recognition_rnn_sequence(xs, h, p, dims=dims, chunk=CHUNK))
    out_seq, h_T = fwd_seq(x_seq, h0, prep)
    out_seq = jax.block_until_ready(out_seq)
    h_T = jax.block_until_ready(h_T)

    # Single-step API (module parity: forward(x, h) -> (out, h)).
    fwd_step = jax.jit(
        lambda x, h, p: recognition_rnn_forward(x, h, p, dims=dims))
    out0, h1 = fwd_step(x_seq[0], h0, prep)
    out0 = jax.block_until_ready(out0)
    h1 = jax.block_until_ready(h1)

    # Pure-JAX reference: apply the PyTorch forward step-by-step.
    h_ref = h0
    outs_ref = []
    for t in range(T):
        o_ref, h_ref = reference_forward(x_seq[t], h_ref, params)
        outs_ref.append(o_ref)
    outs_ref = jnp.stack(outs_ref)

    assert out_seq.shape == (T, nbatch, 2 * latent_dim), out_seq.shape
    assert h_T.shape == (nbatch, nhidden), h_T.shape
    assert jnp.allclose(out_seq, outs_ref, atol=1e-4, rtol=1e-4), "sequence out mismatch"
    assert jnp.allclose(h_T, h_ref, atol=1e-4, rtol=1e-4), "final hidden mismatch"
    assert jnp.allclose(out0, outs_ref[0], atol=1e-4, rtol=1e-4), "single-step out mismatch"
    assert jnp.allclose(h1, jnp.tanh(jnp.concatenate([x_seq[0], h0], 1) @ params["w_i2h"].T
                                     + params["b_i2h"]), atol=1e-4), "single-step h mismatch"
    print("KERNEL_OK")
</pallas_src>

<mosaic_0001>
module attributes {stable_mosaic.version = 11 : i64} {
  func.func @_rnn_seq_kernel(%arg0: i32, %arg1: memref<8x8x8xf32, #tpu.memory_space<vmem>>, %arg2: memref<8x128xf32, #tpu.memory_space<vmem>>, %arg3: memref<8x128xf32, #tpu.memory_space<vmem>>, %arg4: memref<128x128xf32, #tpu.memory_space<vmem>>, %arg5: memref<8x128xf32, #tpu.memory_space<vmem>>, %arg6: memref<128x128xf32, #tpu.memory_space<vmem>>, %arg7: memref<8x128xf32, #tpu.memory_space<vmem>>, %arg8: memref<8x8x128xf32, #tpu.memory_space<vmem>>, %arg9: memref<8x128xf32, #tpu.memory_space<vmem>>, %arg10: memref<8x128xf32, #tpu.memory_space<vmem>>) attributes {dimension_semantics = [#tpu.dimension_semantics<arbitrary>], iteration_bounds = array<i64: 3>, scalar_prefetch = 0 : i64, scratch_operands = 1 : i64, tpu.core_type = #tpu.core_type<tc>, window_params = [{transform_indices = @transform_0, window_bounds = array<i64: 8, 8, 8>}, {pipeline_mode = #tpu.pipeline_mode<synchronous>, transform_indices = @transform_1, window_bounds = array<i64: 8, 128>}, {pipeline_mode = #tpu.pipeline_mode<synchronous>, transform_indices = @transform_2, window_bounds = array<i64: 8, 128>}, {pipeline_mode = #tpu.pipeline_mode<synchronous>, transform_indices = @transform_3, window_bounds = array<i64: 128, 128>}, {pipeline_mode = #tpu.pipeline_mode<synchronous>, transform_indices = @transform_4, window_bounds = array<i64: 8, 128>}, {pipeline_mode = #tpu.pipeline_mode<synchronous>, transform_indices = @transform_5, window_bounds = array<i64: 128, 128>}, {pipeline_mode = #tpu.pipeline_mode<synchronous>, transform_indices = @transform_6, window_bounds = array<i64: 8, 128>}, {transform_indices = @transform_7, window_bounds = array<i64: 8, 8, 128>}, {pipeline_mode = #tpu.pipeline_mode<synchronous>, transform_indices = @transform_8, window_bounds = array<i64: 8, 128>}]} {
    %c0_i32 = arith.constant 0 : i32
    %0 = arith.cmpi eq, %arg0, %c0_i32 : i32
    %1 = arith.extui %0 : i1 to i32
    %c0_i32_0 = arith.constant 0 : i32
    %2 = arith.cmpi ne, %1, %c0_i32_0 : i32
    scf.if %2 {
      %c0_34 = arith.constant 0 : index
      %c0_35 = arith.constant 0 : index
      %48 = vector.load %arg2[%c0_34, %c0_35] : memref<8x128xf32, #tpu.memory_space<vmem>>, vector<8x128xf32>
      %c0_36 = arith.constant 0 : index
      %c0_37 = arith.constant 0 : index
      %49 = vector.load %arg10[%c0_36, %c0_37] : memref<8x128xf32, #tpu.memory_space<vmem>>, vector<8x128xf32>
      tpu.vector_store %arg10[%c0_36, %c0_37], %48 {strides = array<i32>} : memref<8x128xf32, #tpu.memory_space<vmem>>, vector<8x128xf32>,
    } else {
    }
    %c0 = arith.constant 0 : index
    %c0_1 = arith.constant 0 : index
    %3 = vector.load %arg3[%c0, %c0_1] : memref<8x128xf32, #tpu.memory_space<vmem>>, vector<8x128xf32>
    %c0_2 = arith.constant 0 : index
    %c0_3 = arith.constant 0 : index
    %4 = vector.load %arg4[%c0_2, %c0_3] : memref<128x128xf32, #tpu.memory_space<vmem>>, vector<128x128xf32>
    %c0_4 = arith.constant 0 : index
    %c0_5 = arith.constant 0 : index
    %5 = vector.load %arg6[%c0_4, %c0_5] : memref<128x128xf32, #tpu.memory_space<vmem>>, vector<128x128xf32>
    %c0_6 = arith.constant 0 : index
    %c0_7 = arith.constant 0 : index
    %6 = vector.load %arg5[%c0_6, %c0_7] : memref<8x128xf32, #tpu.memory_space<vmem>>, vector<8x128xf32>
    %c0_8 = arith.constant 0 : index
    %c0_9 = arith.constant 0 : index
    %7 = vector.load %arg7[%c0_8, %c0_9] : memref<8x128xf32, #tpu.memory_space<vmem>>, vector<8x128xf32>
    %c0_i32_10 = arith.constant 0 : i32
    %c8_i32 = arith.constant 8 : i32
    %8 = arith.muli %arg0, %c8_i32 : i32
    %9 = arith.addi %8, %c0_i32_10 : i32
    %c20_i32 = arith.constant 20 : i32
    %10 = arith.cmpi slt, %9, %c20_i32 : i32
    %11 = arith.extui %10 : i1 to i32
    %c0_i32_11 = arith.constant 0 : i32
    %12 = arith.cmpi ne, %11, %c0_i32_11 : i32
    scf.if %12 {
      %c0_34 = arith.constant 0 : index
      %c0_35 = arith.constant 0 : index
      %48 = vector.load %arg10[%c0_34, %c0_35] : memref<8x128xf32, #tpu.memory_space<vmem>>, vector<8x128xf32>
      %49 = arith.index_cast %c0_i32_10 : i32 to index
      %c0_36 = arith.constant 0 : index
      %c0_37 = arith.constant 0 : index
      %50 = vector.load %arg1[%49, %c0_36, %c0_37] : memref<8x8x8xf32, #tpu.memory_space<vmem>>, vector<1x8x8xf32>
      %51 = vector.shape_cast %50 : vector<1x8x8xf32> to vector<8x8xf32>
      %cst = arith.constant dense<0.000000e+00> : vector<8x128xf32>
      %52 = tpu.matmul %51, %3, %cst {dimension_numbers = #tpu.dot_dimension_numbers<[1], [0], [0], [1], [0, 0, 1, 1], [], []>} : vector<8x8xf32>, vector<8x128xf32>, vector<8x128xf32> -> vector<8x128xf32>
      %cst_38 = arith.constant dense<0.000000e+00> : vector<8x128xf32>
      %53 = tpu.matmul %48, %4, %cst_38 {dimension_numbers = #tpu.dot_dimension_numbers<[1], [0], [0], [1], [0, 0, 1, 1], [], []>} : vector<8x128xf32>, vector<128x128xf32>, vector<8x128xf32> -> vector<8x128xf32>
      %54 = arith.addf %52, %53 : vector<8x128xf32>
      %55 = arith.addf %54, %6 : vector<8x128xf32>
      %56 = math.tanh %55 : vector<8x128xf32>
      %cst_39 = arith.constant dense<0.000000e+00> : vector<8x128xf32>
      %57 = tpu.matmul %56, %5, %cst_39 {dimension_numbers = #tpu.dot_dimension_numbers<[1], [0], [0], [1], [0, 0, 1, 1], [], []>} : vector<8x128xf32>, vector<128x128xf32>, vector<8x128xf32> -> vector<8x128xf32>
      %58 = arith.addf %57, %7 : vector<8x128xf32>
      %59 = arith.index_cast %c0_i32_10 : i32 to index
      %c0_40 = arith.constant 0 : index
      %c0_41 = arith.constant 0 : index
      %60 = vector.load %arg8[%59, %c0_40, %c0_41] : memref<8x8x128xf32, #tpu.memory_space<vmem>>, vector<1x8x128xf32>
      %61 = vector.shape_cast %60 : vector<1x8x128xf32> to vector<8x128xf32>
      %62 = vector.shape_cast %58 : vector<8x128xf32> to vector<1x8x128xf32>
      tpu.vector_store %arg8[%59, %c0_40, %c0_41], %62 {strides = array<i32>} : memref<8x8x128xf32, #tpu.memory_space<vmem>>, vector<1x8x128xf32>,
      %c0_42 = arith.constant 0 : index
      %c0_43 = arith.constant 0 : index
      %63 = vector.load %arg10[%c0_42, %c0_43] : memref<8x128xf32, #tpu.memory_space<vmem>>, vector<8x128xf32>
      tpu.vector_store %arg10[%c0_42, %c0_43], %56 {strides = array<i32>} : memref<8x128xf32, #tpu.memory_space<vmem>>, vector<8x128xf32>,
      %c19_i32 = arith.constant 19 : i32
      %64 = arith.cmpi eq, %9, %c19_i32 : i32
      %65 = arith.extui %64 : i1 to i32
      %c0_i32_44 = arith.constant 0 : i32
      %66 = arith.cmpi ne, %65, %c0_i32_44 : i32
      scf.if %66 {
        %c0_45 = arith.constant 0 : index
        %c0_46 = arith.constant 0 : index
        %67 = vector.load %arg9[%c0_45, %c0_46] : memref<8x128xf32, #tpu.memory_space<vmem>>, vector<8x128xf32>
        tpu.vector_store %arg9[%c0_45, %c0_46], %56 {strides = array<i32>} : memref<8x128xf32, #tpu.memory_space<vmem>>, vector<8x128xf32>,
      } else {
      }
    } else {
    }
    %c1_i32 = arith.constant 1 : i32
    %c8_i32_12 = arith.constant 8 : i32
    %13 = arith.muli %arg0, %c8_i32_12 : i32
    %14 = arith.addi %13, %c1_i32 : i32
    %c20_i32_13 = arith.constant 20 : i32
    %15 = arith.cmpi slt, %14, %c20_i32_13 : i32
    %16 = arith.extui %15 : i1 to i32
    %c0_i32_14 = arith.constant 0 : i32
    %17 = arith.cmpi ne, %16, %c0_i32_14 : i32
    scf.if %17 {
      %c0_34 = arith.constant 0 : index
      %c0_35 = arith.constant 0 : index
      %48 = vector.load %arg10[%c0_34, %c0_35] : memref<8x128xf32, #tpu.memory_space<vmem>>, vector<8x128xf32>
      %49 = arith.index_cast %c1_i32 : i32 to index
      %c0_36 = arith.constant 0 : index
      %c0_37 = arith.constant 0 : index
      %50 = vector.load %arg1[%49, %c0_36, %c0_37] : memref<8x8x8xf32, #tpu.memory_space<vmem>>, vector<1x8x8xf32>
      %51 = vector.shape_cast %50 : vector<1x8x8xf32> to vector<8x8xf32>
      %cst = arith.constant dense<0.000000e+00> : vector<8x128xf32>
      %52 = tpu.matmul %51, %3, %cst {dimension_numbers = #tpu.dot_dimension_numbers<[1], [0], [0], [1], [0, 0, 1, 1], [], []>} : vector<8x8xf32>, vector<8x128xf32>, vector<8x128xf32> -> vector<8x128xf32>
      %cst_38 = arith.constant dense<0.000000e+00> : vector<8x128xf32>
      %53 = tpu.matmul %48, %4, %cst_38 {dimension_numbers = #tpu.dot_dimension_numbers<[1], [0], [0], [1], [0, 0, 1, 1], [], []>} : vector<8x128xf32>, vector<128x128xf32>, vector<8x128xf32> -> vector<8x128xf32>
      %54 = arith.addf %52, %53 : vector<8x128xf32>
      %55 = arith.addf %54, %6 : vector<8x128xf32>
      %56 = math.tanh %55 : vector<8x128xf32>
      %cst_39 = arith.constant dense<0.000000e+00> : vector<8x128xf32>
      %57 = tpu.matmul %56, %5, %cst_39 {dimension_numbers = #tpu.dot_dimension_numbers<[1], [0], [0], [1], [0, 0, 1, 1], [], []>} : vector<8x128xf32>, vector<128x128xf32>, vector<8x128xf32> -> vector<8x128xf32>
      %58 = arith.addf %57, %7 : vector<8x128xf32>
      %59 = arith.index_cast %c1_i32 : i32 to index
      %c0_40 = arith.constant 0 : index
      %c0_41 = arith.constant 0 : index
      %60 = vector.load %arg8[%59, %c0_40, %c0_41] : memref<8x8x128xf32, #tpu.memory_space<vmem>>, vector<1x8x128xf32>
      %61 = vector.shape_cast %60 : vector<1x8x128xf32> to vector<8x128xf32>
      %62 = vector.shape_cast %58 : vector<8x128xf32> to vector<1x8x128xf32>
      tpu.vector_store %arg8[%59, %c0_40, %c0_41], %62 {strides = array<i32>} : memref<8x8x128xf32, #tpu.memory_space<vmem>>, vector<1x8x128xf32>,
      %c0_42 = arith.constant 0 : index
      %c0_43 = arith.constant 0 : index
      %63 = vector.load %arg10[%c0_42, %c0_43] : memref<8x128xf32, #tpu.memory_space<vmem>>, vector<8x128xf32>
      tpu.vector_store %arg10[%c0_42, %c0_43], %56 {strides = array<i32>} : memref<8x128xf32, #tpu.memory_space<vmem>>, vector<8x128xf32>,
      %c19_i32 = arith.constant 19 : i32
      %64 = arith.cmpi eq, %14, %c19_i32 : i32
      %65 = arith.extui %64 : i1 to i32
      %c0_i32_44 = arith.constant 0 : i32
      %66 = arith.cmpi ne, %65, %c0_i32_44 : i32
      scf.if %66 {
        %c0_45 = arith.constant 0 : index
        %c0_46 = arith.constant 0 : index
        %67 = vector.load %arg9[%c0_45, %c0_46] : memref<8x128xf32, #tpu.memory_space<vmem>>, vector<8x128xf32>
        tpu.vector_store %arg9[%c0_45, %c0_46], %56 {strides = array<i32>} : memref<8x128xf32, #tpu.memory_space<vmem>>, vector<8x128xf32>,
      } else {
      }
    } else {
    }
    %c2_i32 = arith.constant 2 : i32
    %c8_i32_15 = arith.constant 8 : i32
    %18 = arith.muli %arg0, %c8_i32_15 : i32
    %19 = arith.addi %18, %c2_i32 : i32
    %c20_i32_16 = arith.constant 20 : i32
    %20 = arith.cmpi slt, %19, %c20_i32_16 : i32
    %21 = arith.extui %20 : i1 to i32
    %c0_i32_17 = arith.constant 0 : i32
    %22 = arith.cmpi ne, %21, %c0_i32_17 : i32
    scf.if %22 {
      %c0_34 = arith.constant 0 : index
      %c0_35 = arith.constant 0 : index
      %48 = vector.load %arg10[%c0_34, %c0_35] : memref<8x128xf32, #tpu.memory_space<vmem>>, vector<8x128xf32>
      %49 = arith.index_cast %c2_i32 : i32 to index
      %c0_36 = arith.constant 0 : index
      %c0_37 = arith.constant 0 : index
      %50 = vector.load %arg1[%49, %c0_36, %c0_37] : memref<8x8x8xf32, #tpu.memory_space<vmem>>, vector<1x8x8xf32>
      %51 = vector.shape_cast %50 : vector<1x8x8xf32> to vector<8x8xf32>
      %cst = arith.constant dense<0.000000e+00> : vector<8x128xf32>
      %52 = tpu.matmul %51, %3, %cst {dimension_numbers = #tpu.dot_dimension_numbers<[1], [0], [0], [1], [0, 0, 1, 1], [], []>} : vector<8x8xf32>, vector<8x128xf32>, vector<8x128xf32> -> vector<8x128xf32>
      %cst_38 = arith.constant dense<0.000000e+00> : vector<8x128xf32>
      %53 = tpu.matmul %48, %4, %cst_38 {dimension_numbers = #tpu.dot_dimension_numbers<[1], [0], [0], [1], [0, 0, 1, 1], [], []>} : vector<8x128xf32>, vector<128x128xf32>, vector<8x128xf32> -> vector<8x128xf32>
      %54 = arith.addf %52, %53 : vector<8x128xf32>
      %55 = arith.addf %54, %6 : vector<8x128xf32>
      %56 = math.tanh %55 : vector<8x128xf32>
      %cst_39 = arith.constant dense<0.000000e+00> : vector<8x128xf32>
      %57 = tpu.matmul %56, %5, %cst_39 {dimension_numbers = #tpu.dot_dimension_numbers<[1], [0], [0], [1], [0, 0, 1, 1], [], []>} : vector<8x128xf32>, vector<128x128xf32>, vector<8x128xf32> -> vector<8x128xf32>
      %58 = arith.addf %57, %7 : vector<8x128xf32>
      %59 = arith.index_cast %c2_i32 : i32 to index
      %c0_40 = arith.constant 0 : index
      %c0_41 = arith.constant 0 : index
      %60 = vector.load %arg8[%59, %c0_40, %c0_41] : memref<8x8x128xf32, #tpu.memory_space<vmem>>, vector<1x8x128xf32>
      %61 = vector.shape_cast %60 : vector<1x8x128xf32> to vector<8x128xf32>
      %62 = vector.shape_cast %58 : vector<8x128xf32> to vector<1x8x128xf32>
      tpu.vector_store %arg8[%59, %c0_40, %c0_41], %62 {strides = array<i32>} : memref<8x8x128xf32, #tpu.memory_space<vmem>>, vector<1x8x128xf32>,
      %c0_42 = arith.constant 0 : index
      %c0_43 = arith.constant 0 : index
      %63 = vector.load %arg10[%c0_42, %c0_43] : memref<8x128xf32, #tpu.memory_space<vmem>>, vector<8x128xf32>
      tpu.vector_store %arg10[%c0_42, %c0_43], %56 {strides = array<i32>} : memref<8x128xf32, #tpu.memory_space<vmem>>, vector<8x128xf32>,
      %c19_i32 = arith.constant 19 : i32
      %64 = arith.cmpi eq, %19, %c19_i32 : i32
      %65 = arith.extui %64 : i1 to i32
      %c0_i32_44 = arith.constant 0 : i32
      %66 = arith.cmpi ne, %65, %c0_i32_44 : i32
      scf.if %66 {
        %c0_45 = arith.constant 0 : index
        %c0_46 = arith.constant 0 : index
        %67 = vector.load %arg9[%c0_45, %c0_46] : memref<8x128xf32, #tpu.memory_space<vmem>>, vector<8x128xf32>
        tpu.vector_store %arg9[%c0_45, %c0_46], %56 {strides = array<i32>} : memref<8x128xf32, #tpu.memory_space<vmem>>, vector<8x128xf32>,
      } else {
      }
    } else {
    }
    %c3_i32 = arith.constant 3 : i32
    %c8_i32_18 = arith.constant 8 : i32
    %23 = arith.muli %arg0, %c8_i32_18 : i32
    %24 = arith.addi %23, %c3_i32 : i32
    %c20_i32_19 = arith.constant 20 : i32
    %25 = arith.cmpi slt, %24, %c20_i32_19 : i32
    %26 = arith.extui %25 : i1 to i32
    %c0_i32_20 = arith.constant 0 : i32
    %27 = arith.cmpi ne, %26, %c0_i32_20 : i32
    scf.if %27 {
      %c0_34 = arith.constant 0 : index
      %c0_35 = arith.constant 0 : index
      %48 = vector.load %arg10[%c0_34, %c0_35] : memref<8x128xf32, #tpu.memory_space<vmem>>, vector<8x128xf32>
      %49 = arith.index_cast %c3_i32 : i32 to index
      %c0_36 = arith.constant 0 : index
      %c0_37 = arith.constant 0 : index
      %50 = vector.load %arg1[%49, %c0_36, %c0_37] : memref<8x8x8xf32, #tpu.memory_space<vmem>>, vector<1x8x8xf32>
      %51 = vector.shape_cast %50 : vector<1x8x8xf32> to vector<8x8xf32>
      %cst = arith.constant dense<0.000000e+00> : vector<8x128xf32>
      %52 = tpu.matmul %51, %3, %cst {dimension_numbers = #tpu.dot_dimension_numbers<[1], [0], [0], [1], [0, 0, 1, 1], [], []>} : vector<8x8xf32>, vector<8x128xf32>, vector<8x128xf32> -> vector<8x128xf32>
      %cst_38 = arith.constant dense<0.000000e+00> : vector<8x128xf32>
      %53 = tpu.matmul %48, %4, %cst_38 {dimension_numbers = #tpu.dot_dimension_numbers<[1], [0], [0], [1], [0, 0, 1, 1], [], []>} : vector<8x128xf32>, vector<128x128xf32>, vector<8x128xf32> -> vector<8x128xf32>
      %54 = arith.addf %52, %53 : vector<8x128xf32>
      %55 = arith.addf %54, %6 : vector<8x128xf32>
      %56 = math.tanh %55 : vector<8x128xf32>
      %cst_39 = arith.constant dense<0.000000e+00> : vector<8x128xf32>
      %57 = tpu.matmul %56, %5, %cst_39 {dimension_numbers = #tpu.dot_dimension_numbers<[1], [0], [0], [1], [0, 0, 1, 1], [], []>} : vector<8x128xf32>, vector<128x128xf32>, vector<8x128xf32> -> vector<8x128xf32>
      %58 = arith.addf %57, %7 : vector<8x128xf32>
      %59 = arith.index_cast %c3_i32 : i32 to index
      %c0_40 = arith.constant 0 : index
      %c0_41 = arith.constant 0 : index
      %60 = vector.load %arg8[%59, %c0_40, %c0_41] : memref<8x8x128xf32, #tpu.memory_space<vmem>>, vector<1x8x128xf32>
      %61 = vector.shape_cast %60 : vector<1x8x128xf32> to vector<8x128xf32>
      %62 = vector.shape_cast %58 : vector<8x128xf32> to vector<1x8x128xf32>
      tpu.vector_store %arg8[%59, %c0_40, %c0_41], %62 {strides = array<i32>} : memref<8x8x128xf32, #tpu.memory_space<vmem>>, vector<1x8x128xf32>,
      %c0_42 = arith.constant 0 : index
      %c0_43 = arith.constant 0 : index
      %63 = vector.load %arg10[%c0_42, %c0_43] : memref<8x128xf32, #tpu.memory_space<vmem>>, vector<8x128xf32>
      tpu.vector_store %arg10[%c0_42, %c0_43], %56 {strides = array<i32>} : memref<8x128xf32, #tpu.memory_space<vmem>>, vector<8x128xf32>,
      %c19_i32 = arith.constant 19 : i32
      %64 = arith.cmpi eq, %24, %c19_i32 : i32
      %65 = arith.extui %64 : i1 to i32
      %c0_i32_44 = arith.constant 0 : i32
      %66 = arith.cmpi ne, %65, %c0_i32_44 : i32
      scf.if %66 {
        %c0_45 = arith.constant 0 : index
        %c0_46 = arith.constant 0 : index
        %67 = vector.load %arg9[%c0_45, %c0_46] : memref<8x128xf32, #tpu.memory_space<vmem>>, vector<8x128xf32>
        tpu.vector_store %arg9[%c0_45, %c0_46], %56 {strides = array<i32>} : memref<8x128xf32, #tpu.memory_space<vmem>>, vector<8x128xf32>,
      } else {
      }
    } else {
    }
    %c4_i32 = arith.constant 4 : i32
    %c8_i32_21 = arith.constant 8 : i32
    %28 = arith.muli %arg0, %c8_i32_21 : i32
    %29 = arith.addi %28, %c4_i32 : i32
    %c20_i32_22 = arith.constant 20 : i32
    %30 = arith.cmpi slt, %29, %c20_i32_22 : i32
    %31 = arith.extui %30 : i1 to i32
    %c0_i32_23 = arith.constant 0 : i32
    %32 = arith.cmpi ne, %31, %c0_i32_23 : i32
    scf.if %32 {
      %c0_34 = arith.constant 0 : index
      %c0_35 = arith.constant 0 : index
      %48 = vector.load %arg10[%c0_34, %c0_35] : memref<8x128xf32, #tpu.memory_space<vmem>>, vector<8x128xf32>
      %49 = arith.index_cast %c4_i32 : i32 to index
      %c0_36 = arith.constant 0 : index
      %c0_37 = arith.constant 0 : index
      %50 = vector.load %arg1[%49, %c0_36, %c0_37] : memref<8x8x8xf32, #tpu.memory_space<vmem>>, vector<1x8x8xf32>
      %51 = vector.shape_cast %50 : vector<1x8x8xf32> to vector<8x8xf32>
      %cst = arith.constant dense<0.000000e+00> : vector<8x128xf32>
      %52 = tpu.matmul %51, %3, %cst {dimension_numbers = #tpu.dot_dimension_numbers<[1], [0], [0], [1], [0, 0, 1, 1], [], []>} : vector<8x8xf32>, vector<8x128xf32>, vector<8x128xf32> -> vector<8x128xf32>
      %cst_38 = arith.constant dense<0.000000e+00> : vector<8x128xf32>
      %53 = tpu.matmul %48, %4, %cst_38 {dimension_numbers = #tpu.dot_dimension_numbers<[1], [0], [0], [1], [0, 0, 1, 1], [], []>} : vector<8x128xf32>, vector<128x128xf32>, vector<8x128xf32> -> vector<8x128xf32>
      %54 = arith.addf %52, %53 : vector<8x128xf32>
      %55 = arith.addf %54, %6 : vector<8x128xf32>
      %56 = math.tanh %55 : vector<8x128xf32>
      %cst_39 = arith.constant dense<0.000000e+00> : vector<8x128xf32>
      %57 = tpu.matmul %56, %5, %cst_39 {dimension_numbers = #tpu.dot_dimension_numbers<[1], [0], [0], [1], [0, 0, 1, 1], [], []>} : vector<8x128xf32>, vector<128x128xf32>, vector<8x128xf32> -> vector<8x128xf32>
      %58 = arith.addf %57, %7 : vector<8x128xf32>
      %59 = arith.index_cast %c4_i32 : i32 to index
      %c0_40 = arith.constant 0 : index
      %c0_41 = arith.constant 0 : index
      %60 = vector.load %arg8[%59, %c0_40, %c0_41] : memref<8x8x128xf32, #tpu.memory_space<vmem>>, vector<1x8x128xf32>
      %61 = vector.shape_cast %60 : vector<1x8x128xf32> to vector<8x128xf32>
      %62 = vector.shape_cast %58 : vector<8x128xf32> to vector<1x8x128xf32>
      tpu.vector_store %arg8[%59, %c0_40, %c0_41], %62 {strides = array<i32>} : memref<8x8x128xf32, #tpu.memory_space<vmem>>, vector<1x8x128xf32>,
      %c0_42 = arith.constant 0 : index
      %c0_43 = arith.constant 0 : index
      %63 = vector.load %arg10[%c0_42, %c0_43] : memref<8x128xf32, #tpu.memory_space<vmem>>, vector<8x128xf32>
      tpu.vector_store %arg10[%c0_42, %c0_43], %56 {strides = array<i32>} : memref<8x128xf32, #tpu.memory_space<vmem>>, vector<8x128xf32>,
      %c19_i32 = arith.constant 19 : i32
      %64 = arith.cmpi eq, %29, %c19_i32 : i32
      %65 = arith.extui %64 : i1 to i32
      %c0_i32_44 = arith.constant 0 : i32
      %66 = arith.cmpi ne, %65, %c0_i32_44 : i32
      scf.if %66 {
        %c0_45 = arith.constant 0 : index
        %c0_46 = arith.constant 0 : index
        %67 = vector.load %arg9[%c0_45, %c0_46] : memref<8x128xf32, #tpu.memory_space<vmem>>, vector<8x128xf32>
        tpu.vector_store %arg9[%c0_45, %c0_46], %56 {strides = array<i32>} : memref<8x128xf32, #tpu.memory_space<vmem>>, vector<8x128xf32>,
      } else {
      }
    } else {
    }
    %c5_i32 = arith.constant 5 : i32
    %c8_i32_24 = arith.constant 8 : i32
    %33 = arith.muli %arg0, %c8_i32_24 : i32
    %34 = arith.addi %33, %c5_i32 : i32
    %c20_i32_25 = arith.constant 20 : i32
    %35 = arith.cmpi slt, %34, %c20_i32_25 : i32
    %36 = arith.extui %35 : i1 to i32
    %c0_i32_26 = arith.constant 0 : i32
    %37 = arith.cmpi ne, %36, %c0_i32_26 : i32
    scf.if %37 {
      %c0_34 = arith.constant 0 : index
      %c0_35 = arith.constant 0 : index
      %48 = vector.load %arg10[%c0_34, %c0_35] : memref<8x128xf32, #tpu.memory_space<vmem>>, vector<8x128xf32>
      %49 = arith.index_cast %c5_i32 : i32 to index
      %c0_36 = arith.constant 0 : index
      %c0_37 = arith.constant 0 : index
      %50 = vector.load %arg1[%49, %c0_36, %c0_37] : memref<8x8x8xf32, #tpu.memory_space<vmem>>, vector<1x8x8xf32>
      %51 = vector.shape_cast %50 : vector<1x8x8xf32> to vector<8x8xf32>
      %cst = arith.constant dense<0.000000e+00> : vector<8x128xf32>
      %52 = tpu.matmul %51, %3, %cst {dimension_numbers = #tpu.dot_dimension_numbers<[1], [0], [0], [1], [0, 0, 1, 1], [], []>} : vector<8x8xf32>, vector<8x128xf32>, vector<8x128xf32> -> vector<8x128xf32>
      %cst_38 = arith.constant dense<0.000000e+00> : vector<8x128xf32>
      %53 = tpu.matmul %48, %4, %cst_38 {dimension_numbers = #tpu.dot_dimension_numbers<[1], [0], [0], [1], [0, 0, 1, 1], [], []>} : vector<8x128xf32>, vector<128x128xf32>, vector<8x128xf32> -> vector<8x128xf32>
      %54 = arith.addf %52, %53 : vector<8x128xf32>
      %55 = arith.addf %54, %6 : vector<8x128xf32>
      %56 = math.tanh %55 : vector<8x128xf32>
      %cst_39 = arith.constant dense<0.000000e+00> : vector<8x128xf32>
      %57 = tpu.matmul %56, %5, %cst_39 {dimension_numbers = #tpu.dot_dimension_numbers<[1], [0], [0], [1], [0, 0, 1, 1], [], []>} : vector<8x128xf32>, vector<128x128xf32>, vector<8x128xf32> -> vector<8x128xf32>
      %58 = arith.addf %57, %7 : vector<8x128xf32>
      %59 = arith.index_cast %c5_i32 : i32 to index
      %c0_40 = arith.constant 0 : index
      %c0_41 = arith.constant 0 : index
      %60 = vector.load %arg8[%59, %c0_40, %c0_41] : memref<8x8x128xf32, #tpu.memory_space<vmem>>, vector<1x8x128xf32>
      %61 = vector.shape_cast %60 : vector<1x8x128xf32> to vector<8x128xf32>
      %62 = vector.shape_cast %58 : vector<8x128xf32> to vector<1x8x128xf32>
      tpu.vector_store %arg8[%59, %c0_40, %c0_41], %62 {strides = array<i32>} : memref<8x8x128xf32, #tpu.memory_space<vmem>>, vector<1x8x128xf32>,
      %c0_42 = arith.constant 0 : index
      %c0_43 = arith.constant 0 : index
      %63 = vector.load %arg10[%c0_42, %c0_43] : memref<8x128xf32, #tpu.memory_space<vmem>>, vector<8x128xf32>
      tpu.vector_store %arg10[%c0_42, %c0_43], %56 {strides = array<i32>} : memref<8x128xf32, #tpu.memory_space<vmem>>, vector<8x128xf32>,
      %c19_i32 = arith.constant 19 : i32
      %64 = arith.cmpi eq, %34, %c19_i32 : i32
      %65 = arith.extui %64 : i1 to i32
      %c0_i32_44 = arith.constant 0 : i32
      %66 = arith.cmpi ne, %65, %c0_i32_44 : i32
      scf.if %66 {
        %c0_45 = arith.constant 0 : index
        %c0_46 = arith.constant 0 : index
        %67 = vector.load %arg9[%c0_45, %c0_46] : memref<8x128xf32, #tpu.memory_space<vmem>>, vector<8x128xf32>
        tpu.vector_store %arg9[%c0_45, %c0_46], %56 {strides = array<i32>} : memref<8x128xf32, #tpu.memory_space<vmem>>, vector<8x128xf32>,
      } else {
      }
    } else {
    }
    %c6_i32 = arith.constant 6 : i32
    %c8_i32_27 = arith.constant 8 : i32
    %38 = arith.muli %arg0, %c8_i32_27 : i32
    %39 = arith.addi %38, %c6_i32 : i32
    %c20_i32_28 = arith.constant 20 : i32
    %40 = arith.cmpi slt, %39, %c20_i32_28 : i32
    %41 = arith.extui %40 : i1 to i32
    %c0_i32_29 = arith.constant 0 : i32
    %42 = arith.cmpi ne, %41, %c0_i32_29 : i32
    scf.if %42 {
      %c0_34 = arith.constant 0 : index
      %c0_35 = arith.constant 0 : index
      %48 = vector.load %arg10[%c0_34, %c0_35] : memref<8x128xf32, #tpu.memory_space<vmem>>, vector<8x128xf32>
      %49 = arith.index_cast %c6_i32 : i32 to index
      %c0_36 = arith.constant 0 : index
      %c0_37 = arith.constant 0 : index
      %50 = vector.load %arg1[%49, %c0_36, %c0_37] : memref<8x8x8xf32, #tpu.memory_space<vmem>>, vector<1x8x8xf32>
      %51 = vector.shape_cast %50 : vector<1x8x8xf32> to vector<8x8xf32>
      %cst = arith.constant dense<0.000000e+00> : vector<8x128xf32>
      %52 = tpu.matmul %51, %3, %cst {dimension_numbers = #tpu.dot_dimension_numbers<[1], [0], [0], [1], [0, 0, 1, 1], [], []>} : vector<8x8xf32>, vector<8x128xf32>, vector<8x128xf32> -> vector<8x128xf32>
      %cst_38 = arith.constant dense<0.000000e+00> : vector<8x128xf32>
      %53 = tpu.matmul %48, %4, %cst_38 {dimension_numbers = #tpu.dot_dimension_numbers<[1], [0], [0], [1], [0, 0, 1, 1], [], []>} : vector<8x128xf32>, vector<128x128xf32>, vector<8x128xf32> -> vector<8x128xf32>
      %54 = arith.addf %52, %53 : vector<8x128xf32>
      %55 = arith.addf %54, %6 : vector<8x128xf32>
      %56 = math.tanh %55 : vector<8x128xf32>
      %cst_39 = arith.constant dense<0.000000e+00> : vector<8x128xf32>
      %57 = tpu.matmul %56, %5, %cst_39 {dimension_numbers = #tpu.dot_dimension_numbers<[1], [0], [0], [1], [0, 0, 1, 1], [], []>} : vector<8x128xf32>, vector<128x128xf32>, vector<8x128xf32> -> vector<8x128xf32>
      %58 = arith.addf %57, %7 : vector<8x128xf32>
      %59 = arith.index_cast %c6_i32 : i32 to index
      %c0_40 = arith.constant 0 : index
      %c0_41 = arith.constant 0 : index
      %60 = vector.load %arg8[%59, %c0_40, %c0_41] : memref<8x8x128xf32, #tpu.memory_space<vmem>>, vector<1x8x128xf32>
      %61 = vector.shape_cast %60 : vector<1x8x128xf32> to vector<8x128xf32>
      %62 = vector.shape_cast %58 : vector<8x128xf32> to vector<1x8x128xf32>
      tpu.vector_store %arg8[%59, %c0_40, %c0_41], %62 {strides = array<i32>} : memref<8x8x128xf32, #tpu.memory_space<vmem>>, vector<1x8x128xf32>,
      %c0_42 = arith.constant 0 : index
      %c0_43 = arith.constant 0 : index
      %63 = vector.load %arg10[%c0_42, %c0_43] : memref<8x128xf32, #tpu.memory_space<vmem>>, vector<8x128xf32>
      tpu.vector_store %arg10[%c0_42, %c0_43], %56 {strides = array<i32>} : memref<8x128xf32, #tpu.memory_space<vmem>>, vector<8x128xf32>,
      %c19_i32 = arith.constant 19 : i32
      %64 = arith.cmpi eq, %39, %c19_i32 : i32
      %65 = arith.extui %64 : i1 to i32
      %c0_i32_44 = arith.constant 0 : i32
      %66 = arith.cmpi ne, %65, %c0_i32_44 : i32
      scf.if %66 {
        %c0_45 = arith.constant 0 : index
        %c0_46 = arith.constant 0 : index
        %67 = vector.load %arg9[%c0_45, %c0_46] : memref<8x128xf32, #tpu.memory_space<vmem>>, vector<8x128xf32>
        tpu.vector_store %arg9[%c0_45, %c0_46], %56 {strides = array<i32>} : memref<8x128xf32, #tpu.memory_space<vmem>>, vector<8x128xf32>,
      } else {
      }
    } else {
    }
    %c7_i32 = arith.constant 7 : i32
    %c8_i32_30 = arith.constant 8 : i32
    %43 = arith.muli %arg0, %c8_i32_30 : i32
    %44 = arith.addi %43, %c7_i32 : i32
    %c20_i32_31 = arith.constant 20 : i32
    %45 = arith.cmpi slt, %44, %c20_i32_31 : i32
    %46 = arith.extui %45 : i1 to i32
    %c0_i32_32 = arith.constant 0 : i32
    %47 = arith.cmpi ne, %46, %c0_i32_32 : i32
    scf.if %47 {
      %c0_34 = arith.constant 0 : index
      %c0_35 = arith.constant 0 : index
      %48 = vector.load %arg10[%c0_34, %c0_35] : memref<8x128xf32, #tpu.memory_space<vmem>>, vector<8x128xf32>
      %49 = arith.index_cast %c7_i32 : i32 to index
      %c0_36 = arith.constant 0 : index
      %c0_37 = arith.constant 0 : index
      %50 = vector.load %arg1[%49, %c0_36, %c0_37] : memref<8x8x8xf32, #tpu.memory_space<vmem>>, vector<1x8x8xf32>
      %51 = vector.shape_cast %50 : vector<1x8x8xf32> to vector<8x8xf32>
      %cst = arith.constant dense<0.000000e+00> : vector<8x128xf32>
      %52 = tpu.matmul %51, %3, %cst {dimension_numbers = #tpu.dot_dimension_numbers<[1], [0], [0], [1], [0, 0, 1, 1], [], []>} : vector<8x8xf32>, vector<8x128xf32>, vector<8x128xf32> -> vector<8x128xf32>
      %cst_38 = arith.constant dense<0.000000e+00> : vector<8x128xf32>
      %53 = tpu.matmul %48, %4, %cst_38 {dimension_numbers = #tpu.dot_dimension_numbers<[1], [0], [0], [1], [0, 0, 1, 1], [], []>} : vector<8x128xf32>, vector<128x128xf32>, vector<8x128xf32> -> vector<8x128xf32>
      %54 = arith.addf %52, %53 : vector<8x128xf32>
      %55 = arith.addf %54, %6 : vector<8x128xf32>
      %56 = math.tanh %55 : vector<8x128xf32>
      %cst_39 = arith.constant dense<0.000000e+00> : vector<8x128xf32>
      %57 = tpu.matmul %56, %5, %cst_39 {dimension_numbers = #tpu.dot_dimension_numbers<[1], [0], [0], [1], [0, 0, 1, 1], [], []>} : vector<8x128xf32>, vector<128x128xf32>, vector<8x128xf32> -> vector<8x128xf32>
      %58 = arith.addf %57, %7 : vector<8x128xf32>
      %59 = arith.index_cast %c7_i32 : i32 to index
      %c0_40 = arith.constant 0 : index
      %c0_41 = arith.constant 0 : index
      %60 = vector.load %arg8[%59, %c0_40, %c0_41] : memref<8x8x128xf32, #tpu.memory_space<vmem>>, vector<1x8x128xf32>
      %61 = vector.shape_cast %60 : vector<1x8x128xf32> to vector<8x128xf32>
      %62 = vector.shape_cast %58 : vector<8x128xf32> to vector<1x8x128xf32>
      tpu.vector_store %arg8[%59, %c0_40, %c0_41], %62 {strides = array<i32>} : memref<8x8x128xf32, #tpu.memory_space<vmem>>, vector<1x8x128xf32>,
      %c0_42 = arith.constant 0 : index
      %c0_43 = arith.constant 0 : index
      %63 = vector.load %arg10[%c0_42, %c0_43] : memref<8x128xf32, #tpu.memory_space<vmem>>, vector<8x128xf32>
      tpu.vector_store %arg10[%c0_42, %c0_43], %56 {strides = array<i32>} : memref<8x128xf32, #tpu.memory_space<vmem>>, vector<8x128xf32>,
      %c19_i32 = arith.constant 19 : i32
      %64 = arith.cmpi eq, %44, %c19_i32 : i32
      %65 = arith.extui %64 : i1 to i32
      %c0_i32_44 = arith.constant 0 : i32
      %66 = arith.cmpi ne, %65, %c0_i32_44 : i32
      scf.if %66 {
        %c0_45 = arith.constant 0 : index
        %c0_46 = arith.constant 0 : index
        %67 = vector.load %arg9[%c0_45, %c0_46] : memref<8x128xf32, #tpu.memory_space<vmem>>, vector<8x128xf32>
        tpu.vector_store %arg9[%c0_45, %c0_46], %56 {strides = array<i32>} : memref<8x128xf32, #tpu.memory_space<vmem>>, vector<8x128xf32>,
      } else {
      }
    } else {
    }
    %c8_i32_33 = arith.constant 8 : i32
    return
  }
  func.func @transform_0(%arg0: i32) -> (i32, i32, i32) {
    %c0_i32 = arith.constant 0 : i32
    %c0_i32_0 = arith.constant 0 : i32
    %c0_i32_1 = arith.constant 0 : i32
    return %arg0, %c0_i32, %c0_i32_0 : i32, i32, i32
  }
  func.func @transform_1(%arg0: i32) -> (i32, i32) {
    %c0_i32 = arith.constant 0 : i32
    %c0_i32_0 = arith.constant 0 : i32
    %c0_i32_1 = arith.constant 0 : i32
    return %c0_i32, %c0_i32_0 : i32, i32
  }
  func.func @transform_2(%arg0: i32) -> (i32, i32) {
    %c0_i32 = arith.constant 0 : i32
    %c0_i32_0 = arith.constant 0 : i32
    %c0_i32_1 = arith.constant 0 : i32
    return %c0_i32, %c0_i32_0 : i32, i32
  }
  func.func @transform_3(%arg0: i32) -> (i32, i32) {
    %c0_i32 = arith.constant 0 : i32
    %c0_i32_0 = arith.constant 0 : i32
    %c0_i32_1 = arith.constant 0 : i32
    return %c0_i32, %c0_i32_0 : i32, i32
  }
  func.func @transform_4(%arg0: i32) -> (i32, i32) {
    %c0_i32 = arith.constant 0 : i32
    %c0_i32_0 = arith.constant 0 : i32
    %c0_i32_1 = arith.constant 0 : i32
    return %c0_i32, %c0_i32_0 : i32, i32
  }
  func.func @transform_5(%arg0: i32) -> (i32, i32) {
    %c0_i32 = arith.constant 0 : i32
    %c0_i32_0 = arith.constant 0 : i32
    %c0_i32_1 = arith.constant 0 : i32
    return %c0_i32, %c0_i32_0 : i32, i32
  }
  func.func @transform_6(%arg0: i32) -> (i32, i32) {
    %c0_i32 = arith.constant 0 : i32
    %c0_i32_0 = arith.constant 0 : i32
    %c0_i32_1 = arith.constant 0 : i32
    return %c0_i32, %c0_i32_0 : i32, i32
  }
  func.func @transform_7(%arg0: i32) -> (i32, i32, i32) {
    %c0_i32 = arith.constant 0 : i32
    %c0_i32_0 = arith.constant 0 : i32
    %c0_i32_1 = arith.constant 0 : i32
    return %arg0, %c0_i32, %c0_i32_0 : i32, i32, i32
  }
  func.func @transform_8(%arg0: i32) -> (i32, i32) {
    %c0_i32 = arith.constant 0 : i32
    %c0_i32_0 = arith.constant 0 : i32
    %c0_i32_1 = arith.constant 0 : i32
    return %c0_i32, %c0_i32_0 : i32, i32
  }
}

</mosaic_0001>

<bundles_post_ra>
// kernel: _lambda_.1
= control target key start
LH: loop header
LB: loop body
LE: loop exit
PB: predicated region body
PF: predicated region fallthrough
CT: control target
= control target key end

     0   :  { %s3312_s27 = smov 0   ;;  %s4184_s0 = inlined_call_operand.vmem [shape: f32[24,8,8], index: 0, kind: input, shape index: {}]   ;;  %s4185_s1 = inlined_call_operand.vmem [shape: f32[8,128], index: 1, kind: input, shape index: {}]   ;;  %s4186_s2 = inlined_call_operand.vmem [shape: f32[8,128], index: 2, kind: input, shape index: {}]   ;;  %s4187_s3 = inlined_call_operand.vmem [shape: f32[128,128], index: 3, kind: input, shape index: {}]   ;;  %s4188_s4 = inlined_call_operand.vmem [shape: f32[8,128], index: 4, kind: input, shape index: {}]   ;;  %s4189_s5 = inlined_call_operand.vmem [shape: f32[128,128], index: 5, kind: input, shape index: {}]   ;;  %s4190_s6 = inlined_call_operand.vmem [shape: f32[8,128], index: 6, kind: input, shape index: {}]   ;;  %s4191_s7 = inlined_call_operand.vmem [shape: f32[24,8,128], index: 7, kind: output, shape index: {0}]   ;;  %s4192_s8 = inlined_call_operand.vmem [shape: f32[8,128], index: 8, kind: output, shape index: {1}]  }
   0x1 LB: > { %s2264_s28 = sadd.s32 4294967295, %s3249_s27   ;;  %p2268_p0 = scmp.ge.s32.totalorder %s3249_s27, 1  ;;  %s3249_s27 = sphi %s3312_s27, %s19_s27  }
   0x2   : > { %p261_p1 = scmp.lt.s32.totalorder %s3249_s27, 4 }
   0x4   : > { %p262_p2 = pnand %p2268_p0, %p261_p1 }
   0x5   : > { %s3320_s29 = sshll.u32 (!%p262_p2), %s2264_s28, 3  ;;  %p2273_p4 = scmp.ne.s32.totalorder (!%p262_p2), %s2264_s28, 0 }
   0x6   : > { %265 = sbr.rel (%p262_p2) target bundleno = 3616 (0xe20), region = 48  ;;  %p296_p3 = scmp.lt.s32.totalorder (!%p262_p2), %s3320_s29, 23 }
   0xb   : > { %s297_s30 = scalar_select %p296_p3, %s3320_s29, 23 }
   0xc   : > { %310 = sbr.rel (%p2273_p4) target bundleno = 19 (0x13), region = 52 }
   0xd   : > { %s2270_s9 = sshll.u32 %s297_s30, 3 }
   0xe   : > { %s3327_s12 = scalar_lea.vmem %s4184_s0, %s2270_s9  ;;  %s3332_s15 = scalar_lea.vmem %s4191_s7, %s2270_s9 }
  0x11   : > { %v311_v0 = vld [vmem:[%s4185_s1] sm:$0xff] }
  0x12   : > { %312 = vst [vmem:[#allocation2] sm:$0xff] %v311_v0 }
  0x13 PF: > { %v3340_v1 = vld [vmem:[%s4186_s2] sm:$0xff]  ;;  %v3350_v3 = vld [vmem:[%s4187_s3 + $0x8] sm:$0xff]  ;;  %v3355_v4 = vld [vmem:[%s4187_s3 + $0x10] sm:$0xff]  ;;  %p2275_p5 = scmp.ge.s32.totalorder %s3320_s29, 20 }
  0x14   : > { %v3345_v2 = vld [vmem:[%s4187_s3] sm:$0xff]  ;;  %v3360_v5 = vld [vmem:[%s4187_s3 + $0x18] sm:$0xff]  ;;  %v3370_v7 = vld [vmem:[%s4187_s3 + $0x28] sm:$0xff]  ;;  %p2277_p6 = scmp.ne.s32.totalorder (!%p2275_p5), %s3320_s29, 19 }
  0x15   : > { %v3365_v6 = vld [vmem:[%s4187_s3 + $0x20] sm:$0xff]  ;;  %v3375_v8 = vld [vmem:[%s4187_s3 + $0x30] sm:$0xff]  ;;  %v3380_v9 = vld [vmem:[%s4187_s3 + $0x38] sm:$0xff] }
  0x16   : > { %v3385_v10 = vld [vmem:[%s4187_s3 + $0x40] sm:$0xff]  ;;  %v3390_v11 = vld [vmem:[%s4187_s3 + $0x48] sm:$0xff]  ;;  %v3395_v12 = vld [vmem:[%s4187_s3 + $0x50] sm:$0xff] }
  0x17   : > { %v3400_v13 = vld [vmem:[%s4187_s3 + $0x58] sm:$0xff]  ;;  %v3405_v14 = vld [vmem:[%s4187_s3 + $0x60] sm:$0xff]  ;;  %v3410_v15 = vld [vmem:[%s4187_s3 + $0x68] sm:$0xff] }
  0x18   : > { %v3415_v16 = vld [vmem:[%s4187_s3 + $0x70] sm:$0xff]  ;;  %v3420_v17 = vld [vmem:[%s4187_s3 + $0x78] sm:$0xff]  ;;  %v3425_v18 = vld [vmem:[%s4189_s5] sm:$0xff] }
  0x19   : > { %v3430_v19 = vld [vmem:[%s4189_s5 + $0x8] sm:$0xff]  ;;  %v3435_v20 = vld [vmem:[%s4189_s5 + $0x10] sm:$0xff]  ;;  %v3440_v21 = vld [vmem:[%s4189_s5 + $0x18] sm:$0xff] }
  0x1a   : > { %v3445_v22 = vld [vmem:[%s4189_s5 + $0x20] sm:$0xff]  ;;  %v3450_v23 = vld [vmem:[%s4189_s5 + $0x28] sm:$0xff]  ;;  %v3455_v24 = vld [vmem:[%s4189_s5 + $0x30] sm:$0xff] }
  0x1b   : > { %v3460_v25 = vld [vmem:[%s4189_s5 + $0x38] sm:$0xff]  ;;  %v3465_v26 = vld [vmem:[%s4189_s5 + $0x40] sm:$0xff]  ;;  %v3470_v27 = vld [vmem:[%s4189_s5 + $0x48] sm:$0xff]  ;;  %352 = sbr.rel (%p2275_p5) target bundleno = 473 (0x1d9), region = 56 }
  0x1c   : > { %v3475_v28 = vld [vmem:[%s4189_s5 + $0x50] sm:$0xff]  ;;  %v3480_v29 = vld [vmem:[%s4189_s5 + $0x58] sm:$0xff]  ;;  %v3485_v30 = vld [vmem:[%s4189_s5 + $0x60] sm:$0xff] }
  0x1d   : > { %v3490_v31 = vld [vmem:[%s4189_s5 + $0x68] sm:$0xff]  ;;  %v3495_v32 = vld [vmem:[%s4189_s5 + $0x70] sm:$0xff]  ;;  %v3500_v33 = vld [vmem:[%s4189_s5 + $0x78] sm:$0xff] }
  0x1e   : > { %v3505_v34 = vld [vmem:[%s4188_s4] sm:$0xff] }
  0x1f   : > { %v3510_v35 = vld [vmem:[%s4190_s6] sm:$0xff] }
  0x20   : > { %v3251_v36 = vmov 0.0   ;;  %v354_v37 = vld [vmem:[%s3327_s12] sm:$0xff]  ;;  %vm425_vm0 = vcmask 64512   ;;  %vm3252_vm1 = vmmov 0  }
  0x21   : > { %2603 = vmatprep.subr.mxu0 %v3251_v36  ;;  %2638 = vmatprep.subr.mxu1 %v3251_v36  ;;  %v353_v38 = vld [vmem:[#allocation2] sm:$0xff] }
  0x22   : > { %2604 = vmatpush3.msra.mxu0 %v3420_v17  ;;  %2639 = vmatpush3.msra.mxu1 %v3340_v1 }
  0x23   : > { %2605 = vmatprep.subr.mxu0 %v3251_v36  ;;  %2640 = vmatprep.mubr.msk.f32.mxu1 %vm3252_vm1, %v3251_v36 }
  0x24   : > { %2606 = vmatpush3.msra.mxu0 %v3415_v16  ;;  %2641 = vmatmul.mubr.msk.f32.vlgmr.msra.gmra.mxu1 %vm425_vm0, %v354_v37 }
  0x25   : > { %2607 = vmatprep.subr.mxu0 %v3251_v36  ;;  %2635 = vmatprep.mubr.msk.f32.mxu0 %vm3252_vm1, %v3251_v36 }
  0x26   : > { %2608 = vmatpush3.msra.mxu0 %v3410_v15  ;;  %2643 = vmatprep.subr.mxu1 %v3251_v36 }
  0x27   : > { %2609 = vmatprep.subr.mxu0 %v3251_v36  ;;  %2644 = vmatpush3.msra.mxu1 %v3500_v33 }
  0x28   : > { %2610 = vmatpush3.msra.mxu0 %v3405_v14  ;;  %2645 = vmatprep.subr.mxu1 %v3251_v36 }
  0x29   : > { %2611 = vmatprep.subr.mxu0 %v3251_v36  ;;  %2646 = vmatpush3.msra.mxu1 %v3495_v32 }
  0x2a   : > { %2612 = vmatpush3.msra.mxu0 %v3400_v13  ;;  %2647 = vmatprep.subr.mxu1 %v3251_v36 }
  0x2b   : > { %2613 = vmatprep.subr.mxu0 %v3251_v36  ;;  %2648 = vmatpush3.msra.mxu1 %v3490_v31 }
  0x2c   : > { %2614 = vmatpush3.msra.mxu0 %v3395_v12  ;;  %2649 = vmatprep.subr.mxu1 %v3251_v36 }
  0x2d   : > { %2615 = vmatprep.subr.mxu0 %v3251_v36  ;;  %2650 = vmatpush3.msra.mxu1 %v3485_v30 }
  0x2e   : > { %2616 = vmatpush3.msra.mxu0 %v3390_v11  ;;  %2651 = vmatprep.subr.mxu1 %v3251_v36 }
  0x2f   : > { %2617 = vmatprep.subr.mxu0 %v3251_v36  ;;  %2652 = vmatpush3.msra.mxu1 %v3480_v29 }
  0x30   : > { %2618 = vmatpush3.msra.mxu0 %v3385_v10  ;;  %2653 = vmatprep.subr.mxu1 %v3251_v36 }
  0x31   : > { %2619 = vmatprep.subr.mxu0 %v3251_v36  ;;  %2654 = vmatpush3.msra.mxu1 %v3475_v28 }
  0x32   : > { %2620 = vmatpush3.msra.mxu0 %v3380_v9  ;;  %2655 = vmatprep.subr.mxu1 %v3251_v36 }
  0x33   : > { %2621 = vmatprep.subr.mxu0 %v3251_v36  ;;  %2656 = vmatpush3.msra.mxu1 %v3470_v27 }
  0x34   : > { %2622 = vmatpush3.msra.mxu0 %v3375_v8  ;;  %2657 = vmatprep.subr.mxu1 %v3251_v36 }
  0x35   : > { %2623 = vmatprep.subr.mxu0 %v3251_v36  ;;  %2658 = vmatpush3.msra.mxu1 %v3465_v26 }
  0x36   : > { %2624 = vmatpush3.msra.mxu0 %v3370_v7  ;;  %2659 = vmatprep.subr.mxu1 %v3251_v36 }
  0x37   : > { %2625 = vmatprep.subr.mxu0 %v3251_v36  ;;  %2660 = vmatpush3.msra.mxu1 %v3460_v25 }
  0x38   : > { %2626 = vmatpush3.msra.mxu0 %v3365_v6  ;;  %2661 = vmatprep.subr.mxu1 %v3251_v36 }
  0x39   : > { %2627 = vmatprep.subr.mxu0 %v3251_v36  ;;  %2662 = vmatpush3.msra.mxu1 %v3455_v24 }
  0x3a   : > { %2628 = vmatpush3.msra.mxu0 %v3360_v5  ;;  %2663 = vmatprep.subr.mxu1 %v3251_v36 }
  0x3b   : > { %2629 = vmatprep.subr.mxu0 %v3251_v36  ;;  %2664 = vmatpush3.msra.mxu1 %v3450_v23 }
  0x3c   : > { %2630 = vmatpush3.msra.mxu0 %v3355_v4  ;;  %2665 = vmatprep.subr.mxu1 %v3251_v36 }
  0x3d   : > { %2631 = vmatprep.subr.mxu0 %v3251_v36  ;;  %2666 = vmatpush3.msra.mxu1 %v3445_v22 }
  0x3e   : > { %2632 = vmatpush3.msra.mxu0 %v3350_v3  ;;  %2667 = vmatprep.subr.mxu1 %v3251_v36 }
  0x3f   : > { %2633 = vmatprep.subr.mxu0 %v3251_v36  ;;  %2668 = vmatpush3.msra.mxu1 %v3440_v21 }
  0x40   : > { %2634 = vmatpush3.msra.mxu0 %v3345_v2  ;;  %2669 = vmatprep.subr.mxu1 %v3251_v36 }
  0x41   : > { %2636 = vmatmul.mubr.f32.vlgmr.msra.gmra.mxu0 %v353_v38  ;;  %2670 = vmatpush3.msra.mxu1 %v3435_v20 }
  0x42   : > { %2671 = vmatprep.subr.mxu1 %v3251_v36  ;;  %2675 = vmatprep.mubr.msk.f32.mxu1 %vm3252_vm1, %v3251_v36 }
  0x43   : > { %2672 = vmatpush3.msra.mxu1 %v3430_v19 }
  0x44   : > { %2673 = vmatprep.subr.mxu1 %v3251_v36 }
  0x45   : > { %2674 = vmatpush3.msra.mxu1 %v3425_v18 }
  0xe4   : > { %v495_v39 = vpop.f32.mrf.mxu1 }
  0xe6   : > { %v2642_v40 = vpop.f32.mrf.mxu1 }
 0x101   : > { %v421_v41 = vpop.f32.mrf.mxu0 }
 0x102   : > { %v496_v42 = vadd.f32 %v495_v39, %v421_v41 }
 0x103   : > { %v2637_v43 = vpop.f32.mrf.mxu0 }
 0x104   : > { %v499_v44 = vadd.f32 %v496_v42, %v3505_v34 }
 0x106   : > { %3227 = vtanh.f32 %v499_v44 }
 0x113   : > { %v3228_v45 = vpop.eup %3227 }
 0x114   : > { %572 = vst [vmem:[#allocation2] sm:$0xff] %v3228_v45  ;;  %2676 = vmatmul.mubr.f32.vlgmr.msra.gmra.mxu1 %v3228_v45 }
 0x1d3   : > { %576 = sbr.rel (%p2277_p6) target bundleno = 473 (0x1d9), region = 60 }
 0x1d4   : > { %v567_v46 = vpop.f32.mrf.mxu1 }
 0x1d5   : > { %v568_v47 = vadd.f32 %v567_v46, %v3510_v35 }
 0x1d6   : > { %v2677_v48 = vpop.f32.mrf.mxu1 }
 0x1d7   : > { %571 = vst [vmem:[%s3332_s15] sm:$0xff] %v568_v47 }
 0x1d8   : > { %577 = vst [vmem:[%s4192_s8] sm:$0xff] %v3228_v45 }
 0x1d9 PF: > { %s578_s18 = sadd.s32 1, %s3320_s29 }
 0x1da   : > { %p2278_p7 = scmp.ge.s32.totalorder %s578_s18, 20 }
 0x1db   : > { %p2282_p8 = scmp.ne.s32.totalorder (!%p2278_p7), %s578_s18, 19 }
 0x1dc   : > { %582 = sbr.rel (%p2278_p7) target bundleno = 922 (0x39a), region = 64 }
 0x1e1   : > { %v3253_v49 = vmov 0.0   ;;  %v2279_v50 = vld [vmem:[%s3327_s12 + $0x8] sm:$0xff]  ;;  %vm656_vm2 = vcmask 64512   ;;  %vm3254_vm3 = vmmov 0   ;;  %v583_v51 = vld [vmem:[#allocation2] sm:$0xff] }
 0x1e2   : > { %2678 = vmatprep.subr.mxu0 %v3253_v49  ;;  %2713 = vmatprep.subr.mxu1 %v3253_v49 }
 0x1e3   : > { %2679 = vmatpush3.msra.mxu0 %v3420_v17  ;;  %2714 = vmatpush3.msra.mxu1 %v3340_v1 }
 0x1e4   : > { %2680 = vmatprep.subr.mxu0 %v3253_v49  ;;  %2715 = vmatprep.mubr.msk.f32.mxu1 %vm3254_vm3, %v3253_v49 }
 0x1e5   : > { %2681 = vmatpush3.msra.mxu0 %v3415_v16  ;;  %2716 = vmatmul.mubr.msk.f32.vlgmr.msra.gmra.mxu1 %vm656_vm2, %v2279_v50 }
 0x1e6   : > { %2682 = vmatprep.subr.mxu0 %v3253_v49  ;;  %2710 = vmatprep.mubr.msk.f32.mxu0 %vm3254_vm3, %v3253_v49 }
 0x1e7   : > { %2683 = vmatpush3.msra.mxu0 %v3410_v15  ;;  %2718 = vmatprep.subr.mxu1 %v3253_v49 }
 0x1e8   : > { %2684 = vmatprep.subr.mxu0 %v3253_v49  ;;  %2719 = vmatpush3.msra.mxu1 %v3500_v33 }
 0x1e9   : > { %2685 = vmatpush3.msra.mxu0 %v3405_v14  ;;  %2720 = vmatprep.subr.mxu1 %v3253_v49 }
 0x1ea   : > { %2686 = vmatprep.subr.mxu0 %v3253_v49  ;;  %2721 = vmatpush3.msra.mxu1 %v3495_v32 }
 0x1eb   : > { %2687 = vmatpush3.msra.mxu0 %v3400_v13  ;;  %2722 = vmatprep.subr.mxu1 %v3253_v49 }
 0x1ec   : > { %2688 = vmatprep.subr.mxu0 %v3253_v49  ;;  %2723 = vmatpush3.msra.mxu1 %v3490_v31 }
 0x1ed   : > { %2689 = vmatpush3.msra.mxu0 %v3395_v12  ;;  %2724 = vmatprep.subr.mxu1 %v3253_v49 }
 0x1ee   : > { %2690 = vmatprep.subr.mxu0 %v3253_v49  ;;  %2725 = vmatpush3.msra.mxu1 %v3485_v30 }
 0x1ef   : > { %2691 = vmatpush3.msra.mxu0 %v3390_v11  ;;  %2726 = vmatprep.subr.mxu1 %v3253_v49 }
 0x1f0   : > { %2692 = vmatprep.subr.mxu0 %v3253_v49  ;;  %2727 = vmatpush3.msra.mxu1 %v3480_v29 }
 0x1f1   : > { %2693 = vmatpush3.msra.mxu0 %v3385_v10  ;;  %2728 = vmatprep.subr.mxu1 %v3253_v49 }
 0x1f2   : > { %2694 = vmatprep.subr.mxu0 %v3253_v49  ;;  %2729 = vmatpush3.msra.mxu1 %v3475_v28 }
 0x1f3   : > { %2695 = vmatpush3.msra.mxu0 %v3380_v9  ;;  %2730 = vmatprep.subr.mxu1 %v3253_v49 }
 0x1f4   : > { %2696 = vmatprep.subr.mxu0 %v3253_v49  ;;  %2731 = vmatpush3.msra.mxu1 %v3470_v27 }
 0x1f5   : > { %2697 = vmatpush3.msra.mxu0 %v3375_v8  ;;  %2732 = vmatprep.subr.mxu1 %v3253_v49 }
 0x1f6   : > { %2698 = vmatprep.subr.mxu0 %v3253_v49  ;;  %2733 = vmatpush3.msra.mxu1 %v3465_v26 }
 0x1f7   : > { %2699 = vmatpush3.msra.mxu0 %v3370_v7  ;;  %2734 = vmatprep.subr.mxu1 %v3253_v49 }
 0x1f8   : > { %2700 = vmatprep.subr.mxu0 %v3253_v49  ;;  %2735 = vmatpush3.msra.mxu1 %v3460_v25 }
 0x1f9   : > { %2701 = vmatpush3.msra.mxu0 %v3365_v6  ;;  %2736 = vmatprep.subr.mxu1 %v3253_v49 }
 0x1fa   : > { %2702 = vmatprep.subr.mxu0 %v3253_v49  ;;  %2737 = vmatpush3.msra.mxu1 %v3455_v24 }
 0x1fb   : > { %2703 = vmatpush3.msra.mxu0 %v3360_v5  ;;  %2738 = vmatprep.subr.mxu1 %v3253_v49 }
 0x1fc   : > { %2704 = vmatprep.subr.mxu0 %v3253_v49  ;;  %2739 = vmatpush3.msra.mxu1 %v3450_v23 }
 0x1fd   : > { %2705 = vmatpush3.msra.mxu0 %v3355_v4  ;;  %2740 = vmatprep.subr.mxu1 %v3253_v49 }
 0x1fe   : > { %2706 = vmatprep.subr.mxu0 %v3253_v49  ;;  %2741 = vmatpush3.msra.mxu1 %v3445_v22 }
 0x1ff   : > { %2707 = vmatpush3.msra.mxu0 %v3350_v3  ;;  %2742 = vmatprep.subr.mxu1 %v3253_v49 }
 0x200   : > { %2708 = vmatprep.subr.mxu0 %v3253_v49  ;;  %2743 = vmatpush3.msra.mxu1 %v3440_v21 }
 0x201   : > { %2709 = vmatpush3.msra.mxu0 %v3345_v2  ;;  %2744 = vmatprep.subr.mxu1 %v3253_v49 }
 0x202   : > { %2711 = vmatmul.mubr.f32.vlgmr.msra.gmra.mxu0 %v583_v51  ;;  %2745 = vmatpush3.msra.mxu1 %v3435_v20 }
 0x203   : > { %2746 = vmatprep.subr.mxu1 %v3253_v49  ;;  %2750 = vmatprep.mubr.msk.f32.mxu1 %vm3254_vm3, %v3253_v49 }
 0x204   : > { %2747 = vmatpush3.msra.mxu1 %v3430_v19 }
 0x205   : > { %2748 = vmatprep.subr.mxu1 %v3253_v49 }
 0x206   : > { %2749 = vmatpush3.msra.mxu1 %v3425_v18 }
 0x2a5   : > { %v726_v52 = vpop.f32.mrf.mxu1 }
 0x2a7   : > { %v2717_v53 = vpop.f32.mrf.mxu1 }
 0x2c2   : > { %v652_v54 = vpop.f32.mrf.mxu0 }
 0x2c3   : > { %v727_v55 = vadd.f32 %v726_v52, %v652_v54 }
 0x2c4   : > { %v2712_v56 = vpop.f32.mrf.mxu0 }
 0x2c5   : > { %v730_v57 = vadd.f32 %v727_v55, %v3505_v34 }
 0x2c7   : > { %3229 = vtanh.f32 %v730_v57 }
 0x2d4   : > { %v3230_v58 = vpop.eup %3229 }
 0x2d5   : > { %804 = vst [vmem:[#allocation2] sm:$0xff] %v3230_v58  ;;  %2751 = vmatmul.mubr.f32.vlgmr.msra.gmra.mxu1 %v3230_v58 }
 0x394   : > { %808 = sbr.rel (%p2282_p8) target bundleno = 922 (0x39a), region = 68 }
 0x395   : > { %v798_v59 = vpop.f32.mrf.mxu1 }
 0x396   : > { %v799_v60 = vadd.f32 %v798_v59, %v3510_v35 }
 0x397   : > { %v2752_v61 = vpop.f32.mrf.mxu1 }
 0x398   : > { %2281 = vst [vmem:[%s3332_s15 + $0x8] sm:$0xff] %v799_v60 }
 0x399   : > { %809 = vst [vmem:[%s4192_s8] sm:$0xff] %v3230_v58 }
 0x39a PF: > { %s810_s21 = sadd.s32 2, %s3320_s29 }
 0x39b   : > { %p2283_p9 = scmp.ge.s32.totalorder %s810_s21, 20 }
 0x39c   : > { %p2287_p10 = scmp.ne.s32.totalorder (!%p2283_p9), %s810_s21, 19 }
 0x39d   : > { %814 = sbr.rel (%p2283_p9) target bundleno = 1371 (0x55b), region = 72 }
 0x3a2   : > { %v3255_v62 = vmov 0.0   ;;  %v2284_v63 = vld [vmem:[%s3327_s12 + $0x10] sm:$0xff]  ;;  %vm888_vm4 = vcmask 64512   ;;  %vm3256_vm5 = vmmov 0   ;;  %v815_v0 = vld [vmem:[#allocation2] sm:$0xff] }
 0x3a3   : > { %2753 = vmatprep.subr.mxu0 %v3255_v62  ;;  %2788 = vmatprep.subr.mxu1 %v3255_v62 }
 0x3a4   : > { %2754 = vmatpush3.msra.mxu0 %v3420_v17  ;;  %2789 = vmatpush3.msra.mxu1 %v3340_v1 }
 0x3a5   : > { %2755 = vmatprep.subr.mxu0 %v3255_v62  ;;  %2790 = vmatprep.mubr.msk.f32.mxu1 %vm3256_vm5, %v3255_v62 }
 0x3a6   : > { %2756 = vmatpush3.msra.mxu0 %v3415_v16  ;;  %2791 = vmatmul.mubr.msk.f32.vlgmr.msra.gmra.mxu1 %vm888_vm4, %v2284_v63 }
 0x3a7   : > { %2757 = vmatprep.subr.mxu0 %v3255_v62  ;;  %2785 = vmatprep.mubr.msk.f32.mxu0 %vm3256_vm5, %v3255_v62 }
 0x3a8   : > { %2758 = vmatpush3.msra.mxu0 %v3410_v15  ;;  %2793 = vmatprep.subr.mxu1 %v3255_v62 }
 0x3a9   : > { %2759 = vmatprep.subr.mxu0 %v3255_v62  ;;  %2794 = vmatpush3.msra.mxu1 %v3500_v33 }
 0x3aa   : > { %2760 = vmatpush3.msra.mxu0 %v3405_v14  ;;  %2795 = vmatprep.subr.mxu1 %v3255_v62 }
 0x3ab   : > { %2761 = vmatprep.subr.mxu0 %v3255_v62  ;;  %2796 = vmatpush3.msra.mxu1 %v3495_v32 }
 0x3ac   : > { %2762 = vmatpush3.msra.mxu0 %v3400_v13  ;;  %2797 = vmatprep.subr.mxu1 %v3255_v62 }
 0x3ad   : > { %2763 = vmatprep.subr.mxu0 %v3255_v62  ;;  %2798 = vmatpush3.msra.mxu1 %v3490_v31 }
 0x3ae   : > { %2764 = vmatpush3.msra.mxu0 %v3395_v12  ;;  %2799 = vmatprep.subr.mxu1 %v3255_v62 }
 0x3af   : > { %2765 = vmatprep.subr.mxu0 %v3255_v62  ;;  %2800 = vmatpush3.msra.mxu1 %v3485_v30 }
 0x3b0   : > { %2766 = vmatpush3.msra.mxu0 %v3390_v11  ;;  %2801 = vmatprep.subr.mxu1 %v3255_v62 }
 0x3b1   : > { %2767 = vmatprep.subr.mxu0 %v3255_v62  ;;  %2802 = vmatpush3.msra.mxu1 %v3480_v29 }
 0x3b2   : > { %2768 = vmatpush3.msra.mxu0 %v3385_v10  ;;  %2803 = vmatprep.subr.mxu1 %v3255_v62 }
 0x3b3   : > { %2769 = vmatprep.subr.mxu0 %v3255_v62  ;;  %2804 = vmatpush3.msra.mxu1 %v3475_v28 }
 0x3b4   : > { %2770 = vmatpush3.msra.mxu0 %v3380_v9  ;;  %2805 = vmatprep.subr.mxu1 %v3255_v62 }
 0x3b5   : > { %2771 = vmatprep.subr.mxu0 %v3255_v62  ;;  %2806 = vmatpush3.msra.mxu1 %v3470_v27 }
 0x3b6   : > { %2772 = vmatpush3.msra.mxu0 %v3375_v8  ;;  %2807 = vmatprep.subr.mxu1 %v3255_v62 }
 0x3b7   : > { %2773 = vmatprep.subr.mxu0 %v3255_v62  ;;  %2808 = vmatpush3.msra.mxu1 %v3465_v26 }
 0x3b8   : > { %2774 = vmatpush3.msra.mxu0 %v3370_v7  ;;  %2809 = vmatprep.subr.mxu1 %v3255_v62 }
 0x3b9   : > { %2775 = vmatprep.subr.mxu0 %v3255_v62  ;;  %2810 = vmatpush3.msra.mxu1 %v3460_v25 }
 0x3ba   : > { %2776 = vmatpush3.msra.mxu0 %v3365_v6  ;;  %2811 = vmatprep.subr.mxu1 %v3255_v62 }
 0x3bb   : > { %2777 = vmatprep.subr.mxu0 %v3255_v62  ;;  %2812 = vmatpush3.msra.mxu1 %v3455_v24 }
 0x3bc   : > { %2778 = vmatpush3.msra.mxu0 %v3360_v5  ;;  %2813 = vmatprep.subr.mxu1 %v3255_v62 }
 0x3bd   : > { %2779 = vmatprep.subr.mxu0 %v3255_v62  ;;  %2814 = vmatpush3.msra.mxu1 %v3450_v23 }
 0x3be   : > { %2780 = vmatpush3.msra.mxu0 %v3355_v4  ;;  %2815 = vmatprep.subr.mxu1 %v3255_v62 }
 0x3bf   : > { %2781 = vmatprep.subr.mxu0 %v3255_v62  ;;  %2816 = vmatpush3.msra.mxu1 %v3445_v22 }
 0x3c0   : > { %2782 = vmatpush3.msra.mxu0 %v3350_v3  ;;  %2817 = vmatprep.subr.mxu1 %v3255_v62 }
 0x3c1   : > { %2783 = vmatprep.subr.mxu0 %v3255_v62  ;;  %2818 = vmatpush3.msra.mxu1 %v3440_v21 }
 0x3c2   : > { %2784 = vmatpush3.msra.mxu0 %v3345_v2  ;;  %2819 = vmatprep.subr.mxu1 %v3255_v62 }
 0x3c3   : > { %2786 = vmatmul.mubr.f32.vlgmr.msra.gmra.mxu0 %v815_v0  ;;  %2820 = vmatpush3.msra.mxu1 %v3435_v20 }
 0x3c4   : > { %2821 = vmatprep.subr.mxu1 %v3255_v62  ;;  %2825 = vmatprep.mubr.msk.f32.mxu1 %vm3256_vm5, %v3255_v62 }
 0x3c5   : > { %2822 = vmatpush3.msra.mxu1 %v3430_v19 }
 0x3c6   : > { %2823 = vmatprep.subr.mxu1 %v3255_v62 }
 0x3c7   : > { %2824 = vmatpush3.msra.mxu1 %v3425_v18 }
 0x466   : > { %v958_v36 = vpop.f32.mrf.mxu1 }
 0x468   : > { %v2792_v37 = vpop.f32.mrf.mxu1 }
 0x483   : > { %v884_v38 = vpop.f32.mrf.mxu0 }
 0x484   : > { %v959_v39 = vadd.f32 %v958_v36, %v884_v38 }
 0x485   : > { %v2787_v40 = vpop.f32.mrf.mxu0 }
 0x486   : > { %v962_v41 = vadd.f32 %v959_v39, %v3505_v34 }
 0x488   : > { %3231 = vtanh.f32 %v962_v41 }
 0x495   : > { %v3232_v42 = vpop.eup %3231 }
 0x496   : > { %1036 = vst [vmem:[#allocation2] sm:$0xff] %v3232_v42  ;;  %2826 = vmatmul.mubr.f32.vlgmr.msra.gmra.mxu1 %v3232_v42 }
 0x555   : > { %1040 = sbr.rel (%p2287_p10) target bundleno = 1371 (0x55b), region = 76 }
 0x556   : > { %v1030_v43 = vpop.f32.mrf.mxu1 }
 0x557   : > { %v1031_v44 = vadd.f32 %v1030_v43, %v3510_v35 }
 0x558   : > { %v2827_v45 = vpop.f32.mrf.mxu1 }
 0x559   : > { %2286 = vst [vmem:[%s3332_s15 + $0x10] sm:$0xff] %v1031_v44 }
 0x55a   : > { %1041 = vst [vmem:[%s4192_s8] sm:$0xff] %v3232_v42 }
 0x55b PF: > { %s1042_s24 = sadd.s32 3, %s3320_s29 }
 0x55c   : > { %p2288_p11 = scmp.ge.s32.totalorder %s1042_s24, 20 }
 0x55d   : > { %p2292_p12 = scmp.ne.s32.totalorder (!%p2288_p11), %s1042_s24, 19 }
 0x55e   : > { %1046 = sbr.rel (%p2288_p11) target bundleno = 1820 (0x71c), region = 80 }
 0x563   : > { %v3257_v46 = vmov 0.0   ;;  %v2289_v47 = vld [vmem:[%s3327_s12 + $0x18] sm:$0xff]  ;;  %vm1120_vm6 = vcmask 64512   ;;  %vm3258_vm7 = vmmov 0   ;;  %v1047_v48 = vld [vmem:[#allocation2] sm:$0xff] }
 0x564   : > { %2828 = vmatprep.subr.mxu0 %v3257_v46  ;;  %2863 = vmatprep.subr.mxu1 %v3257_v46 }
 0x565   : > { %2829 = vmatpush3.msra.mxu0 %v3420_v17  ;;  %2864 = vmatpush3.msra.mxu1 %v3340_v1 }
 0x566   : > { %2830 = vmatprep.subr.mxu0 %v3257_v46  ;;  %2865 = vmatprep.mubr.msk.f32.mxu1 %vm3258_vm7, %v3257_v46 }
 0x567   : > { %2831 = vmatpush3.msra.mxu0 %v3415_v16  ;;  %2866 = vmatmul.mubr.msk.f32.vlgmr.msra.gmra.mxu1 %vm1120_vm6, %v2289_v47 }
 0x568   : > { %2832 = vmatprep.subr.mxu0 %v3257_v46  ;;  %2860 = vmatprep.mubr.msk.f32.mxu0 %vm3258_vm7, %v3257_v46 }
 0x569   : > { %2833 = vmatpush3.msra.mxu0 %v3410_v15  ;;  %2868 = vmatprep.subr.mxu1 %v3257_v46 }
 0x56a   : > { %2834 = vmatprep.subr.mxu0 %v3257_v46  ;;  %2869 = vmatpush3.msra.mxu1 %v3500_v33 }
 0x56b   : > { %2835 = vmatpush3.msra.mxu0 %v3405_v14  ;;  %2870 = vmatprep.subr.mxu1 %v3257_v46 }
 0x56c   : > { %2836 = vmatprep.subr.mxu0 %v3257_v46  ;;  %2871 = vmatpush3.msra.mxu1 %v3495_v32 }
 0x56d   : > { %2837 = vmatpush3.msra.mxu0 %v3400_v13  ;;  %2872 = vmatprep.subr.mxu1 %v3257_v46 }
 0x56e   : > { %2838 = vmatprep.subr.mxu0 %v3257_v46  ;;  %2873 = vmatpush3.msra.mxu1 %v3490_v31 }
 0x56f   : > { %2839 = vmatpush3.msra.mxu0 %v3395_v12  ;;  %2874 = vmatprep.subr.mxu1 %v3257_v46 }
 0x570   : > { %2840 = vmatprep.subr.mxu0 %v3257_v46  ;;  %2875 = vmatpush3.msra.mxu1 %v3485_v30 }
 0x571   : > { %2841 = vmatpush3.msra.mxu0 %v3390_v11  ;;  %2876 = vmatprep.subr.mxu1 %v3257_v46 }
 0x572   : > { %2842 = vmatprep.subr.mxu0 %v3257_v46  ;;  %2877 = vmatpush3.msra.mxu1 %v3480_v29 }
 0x573   : > { %2843 = vmatpush3.msra.mxu0 %v3385_v10  ;;  %2878 = vmatprep.subr.mxu1 %v3257_v46 }
 0x574   : > { %2844 = vmatprep.subr.mxu0 %v3257_v46  ;;  %2879 = vmatpush3.msra.mxu1 %v3475_v28 }
 0x575   : > { %2845 = vmatpush3.msra.mxu0 %v3380_v9  ;;  %2880 = vmatprep.subr.mxu1 %v3257_v46 }
 0x576   : > { %2846 = vmatprep.subr.mxu0 %v3257_v46  ;;  %2881 = vmatpush3.msra.mxu1 %v3470_v27 }
 0x577   : > { %2847 = vmatpush3.msra.mxu0 %v3375_v8  ;;  %2882 = vmatprep.subr.mxu1 %v3257_v46 }
 0x578   : > { %2848 = vmatprep.subr.mxu0 %v3257_v46  ;;  %2883 = vmatpush3.msra.mxu1 %v3465_v26 }
 0x579   : > { %2849 = vmatpush3.msra.mxu0 %v3370_v7  ;;  %2884 = vmatprep.subr.mxu1 %v3257_v46 }
 0x57a   : > { %2850 = vmatprep.subr.mxu0 %v3257_v46  ;;  %2885 = vmatpush3.msra.mxu1 %v3460_v25 }
 0x57b   : > { %2851 = vmatpush3.msra.mxu0 %v3365_v6  ;;  %2886 = vmatprep.subr.mxu1 %v3257_v46 }
 0x57c   : > { %2852 = vmatprep.subr.mxu0 %v3257_v46  ;;  %2887 = vmatpush3.msra.mxu1 %v3455_v24 }
 0x57d   : > { %2853 = vmatpush3.msra.mxu0 %v3360_v5  ;;  %2888 = vmatprep.subr.mxu1 %v3257_v46 }
 0x57e   : > { %2854 = vmatprep.subr.mxu0 %v3257_v46  ;;  %2889 = vmatpush3.msra.mxu1 %v3450_v23 }
 0x57f   : > { %2855 = vmatpush3.msra.mxu0 %v3355_v4  ;;  %2890 = vmatprep.subr.mxu1 %v3257_v46 }
 0x580   : > { %2856 = vmatprep.subr.mxu0 %v3257_v46  ;;  %2891 = vmatpush3.msra.mxu1 %v3445_v22 }
 0x581   : > { %2857 = vmatpush3.msra.mxu0 %v3350_v3  ;;  %2892 = vmatprep.subr.mxu1 %v3257_v46 }
 0x582   : > { %2858 = vmatprep.subr.mxu0 %v3257_v46  ;;  %2893 = vmatpush3.msra.mxu1 %v3440_v21 }
 0x583   : > { %2859 = vmatpush3.msra.mxu0 %v3345_v2  ;;  %2894 = vmatprep.subr.mxu1 %v3257_v46 }
 0x584   : > { %2861 = vmatmul.mubr.f32.vlgmr.msra.gmra.mxu0 %v1047_v48  ;;  %2895 = vmatpush3.msra.mxu1 %v3435_v20 }
 0x585   : > { %2896 = vmatprep.subr.mxu1 %v3257_v46  ;;  %2900 = vmatprep.mubr.msk.f32.mxu1 %vm3258_vm7, %v3257_v46 }
 0x586   : > { %2897 = vmatpush3.msra.mxu1 %v3430_v19 }
 0x587   : > { %2898 = vmatprep.subr.mxu1 %v3257_v46 }
 0x588   : > { %2899 = vmatpush3.msra.mxu1 %v3425_v18 }
 0x627   : > { %v1190_v49 = vpop.f32.mrf.mxu1 }
 0x629   : > { %v2867_v50 = vpop.f32.mrf.mxu1 }
 0x644   : > { %v1116_v51 = vpop.f32.mrf.mxu0 }
 0x645   : > { %v1191_v52 = vadd.f32 %v1190_v49, %v1116_v51 }
 0x646   : > { %v2862_v53 = vpop.f32.mrf.mxu0 }
 0x647   : > { %v1194_v54 = vadd.f32 %v1191_v52, %v3505_v34 }
 0x649   : > { %3233 = vtanh.f32 %v1194_v54 }
 0x656   : > { %v3234_v55 = vpop.eup %3233 }
 0x657   : > { %1268 = vst [vmem:[#allocation2] sm:$0xff] %v3234_v55  ;;  %2901 = vmatmul.mubr.f32.vlgmr.msra.gmra.mxu1 %v3234_v55 }
 0x716   : > { %1272 = sbr.rel (%p2292_p12) target bundleno = 1820 (0x71c), region = 84 }
 0x717   : > { %v1262_v56 = vpop.f32.mrf.mxu1 }
 0x718   : > { %v1263_v57 = vadd.f32 %v1262_v56, %v3510_v35 }
 0x719   : > { %v2902_v58 = vpop.f32.mrf.mxu1 }
 0x71a   : > { %2291 = vst [vmem:[%s3332_s15 + $0x18] sm:$0xff] %v1263_v57 }
 0x71b   : > { %1273 = vst [vmem:[%s4192_s8] sm:$0xff] %v3234_v55 }
 0x71c PF: > { %s1274_s28 = sadd.s32 4, %s3320_s29 }
 0x71d   : > { %p2293_p13 = scmp.ge.s32.totalorder %s1274_s28, 20 }
 0x71e   : > { %p2297_p0 = scmp.ne.s32.totalorder (!%p2293_p13), %s1274_s28, 19 }
 0x71f   : > { %1278 = sbr.rel (%p2293_p13) target bundleno = 2269 (0x8dd), region = 88 }
 0x724   : > { %v3259_v59 = vmov 0.0   ;;  %v2294_v60 = vld [vmem:[%s3327_s12 + $0x20] sm:$0xff]  ;;  %vm1352_vm8 = vcmask 64512   ;;  %vm3260_vm9 = vmmov 0  }
 0x725   : > { %2903 = vmatprep.subr.mxu0 %v3259_v59  ;;  %2938 = vmatprep.subr.mxu1 %v3259_v59  ;;  %v1279_v61 = vld [vmem:[#allocation2] sm:$0xff] }
 0x726   : > { %2904 = vmatpush3.msra.mxu0 %v3420_v17  ;;  %2939 = vmatpush3.msra.mxu1 %v3340_v1 }
 0x727   : > { %2905 = vmatprep.subr.mxu0 %v3259_v59  ;;  %2940 = vmatprep.mubr.msk.f32.mxu1 %vm3260_vm9, %v3259_v59 }
 0x728   : > { %2906 = vmatpush3.msra.mxu0 %v3415_v16  ;;  %2941 = vmatmul.mubr.msk.f32.vlgmr.msra.gmra.mxu1 %vm1352_vm8, %v2294_v60 }
 0x729   : > { %2907 = vmatprep.subr.mxu0 %v3259_v59  ;;  %2935 = vmatprep.mubr.msk.f32.mxu0 %vm3260_vm9, %v3259_v59 }
 0x72a   : > { %2908 = vmatpush3.msra.mxu0 %v3410_v15  ;;  %2943 = vmatprep.subr.mxu1 %v3259_v59 }
 0x72b   : > { %2909 = vmatprep.subr.mxu0 %v3259_v59  ;;  %2944 = vmatpush3.msra.mxu1 %v3500_v33 }
 0x72c   : > { %2910 = vmatpush3.msra.mxu0 %v3405_v14  ;;  %2945 = vmatprep.subr.mxu1 %v3259_v59 }
 0x72d   : > { %2911 = vmatprep.subr.mxu0 %v3259_v59  ;;  %2946 = vmatpush3.msra.mxu1 %v3495_v32 }
 0x72e   : > { %2912 = vmatpush3.msra.mxu0 %v3400_v13  ;;  %2947 = vmatprep.subr.mxu1 %v3259_v59 }
 0x72f   : > { %2913 = vmatprep.subr.mxu0 %v3259_v59  ;;  %2948 = vmatpush3.msra.mxu1 %v3490_v31 }
 0x730   : > { %2914 = vmatpush3.msra.mxu0 %v3395_v12  ;;  %2949 = vmatprep.subr.mxu1 %v3259_v59 }
 0x731   : > { %2915 = vmatprep.subr.mxu0 %v3259_v59  ;;  %2950 = vmatpush3.msra.mxu1 %v3485_v30 }
 0x732   : > { %2916 = vmatpush3.msra.mxu0 %v3390_v11  ;;  %2951 = vmatprep.subr.mxu1 %v3259_v59 }
 0x733   : > { %2917 = vmatprep.subr.mxu0 %v3259_v59  ;;  %2952 = vmatpush3.msra.mxu1 %v3480_v29 }
 0x734   : > { %2918 = vmatpush3.msra.mxu0 %v3385_v10  ;;  %2953 = vmatprep.subr.mxu1 %v3259_v59 }
 0x735   : > { %2919 = vmatprep.subr.mxu0 %v3259_v59  ;;  %2954 = vmatpush3.msra.mxu1 %v3475_v28 }
 0x736   : > { %2920 = vmatpush3.msra.mxu0 %v3380_v9  ;;  %2955 = vmatprep.subr.mxu1 %v3259_v59 }
 0x737   : > { %2921 = vmatprep.subr.mxu0 %v3259_v59  ;;  %2956 = vmatpush3.msra.mxu1 %v3470_v27 }
 0x738   : > { %2922 = vmatpush3.msra.mxu0 %v3375_v8  ;;  %2957 = vmatprep.subr.mxu1 %v3259_v59 }
 0x739   : > { %2923 = vmatprep.subr.mxu0 %v3259_v59  ;;  %2958 = vmatpush3.msra.mxu1 %v3465_v26 }
 0x73a   : > { %2924 = vmatpush3.msra.mxu0 %v3370_v7  ;;  %2959 = vmatprep.subr.mxu1 %v3259_v59 }
 0x73b   : > { %2925 = vmatprep.subr.mxu0 %v3259_v59  ;;  %2960 = vmatpush3.msra.mxu1 %v3460_v25 }
 0x73c   : > { %2926 = vmatpush3.msra.mxu0 %v3365_v6  ;;  %2961 = vmatprep.subr.mxu1 %v3259_v59 }
 0x73d   : > { %2927 = vmatprep.subr.mxu0 %v3259_v59  ;;  %2962 = vmatpush3.msra.mxu1 %v3455_v24 }
 0x73e   : > { %2928 = vmatpush3.msra.mxu0 %v3360_v5  ;;  %2963 = vmatprep.subr.mxu1 %v3259_v59 }
 0x73f   : > { %2929 = vmatprep.subr.mxu0 %v3259_v59  ;;  %2964 = vmatpush3.msra.mxu1 %v3450_v23 }
 0x740   : > { %2930 = vmatpush3.msra.mxu0 %v3355_v4  ;;  %2965 = vmatprep.subr.mxu1 %v3259_v59 }
 0x741   : > { %2931 = vmatprep.subr.mxu0 %v3259_v59  ;;  %2966 = vmatpush3.msra.mxu1 %v3445_v22 }
 0x742   : > { %2932 = vmatpush3.msra.mxu0 %v3350_v3  ;;  %2967 = vmatprep.subr.mxu1 %v3259_v59 }
 0x743   : > { %2933 = vmatprep.subr.mxu0 %v3259_v59  ;;  %2968 = vmatpush3.msra.mxu1 %v3440_v21 }
 0x744   : > { %2934 = vmatpush3.msra.mxu0 %v3345_v2  ;;  %2969 = vmatprep.subr.mxu1 %v3259_v59 }
 0x745   : > { %2936 = vmatmul.mubr.f32.vlgmr.msra.gmra.mxu0 %v1279_v61  ;;  %2970 = vmatpush3.msra.mxu1 %v3435_v20 }
 0x746   : > { %2971 = vmatprep.subr.mxu1 %v3259_v59  ;;  %2975 = vmatprep.mubr.msk.f32.mxu1 %vm3260_vm9, %v3259_v59 }
 0x747   : > { %2972 = vmatpush3.msra.mxu1 %v3430_v19 }
 0x748   : > { %2973 = vmatprep.subr.mxu1 %v3259_v59 }
 0x749   : > { %2974 = vmatpush3.msra.mxu1 %v3425_v18 }
 0x7e8   : > { %v1422_v62 = vpop.f32.mrf.mxu1 }
 0x7ea   : > { %v2942_v63 = vpop.f32.mrf.mxu1 }
 0x805   : > { %v1348_v0 = vpop.f32.mrf.mxu0 }
 0x806   : > { %v1423_v36 = vadd.f32 %v1422_v62, %v1348_v0 }
 0x807   : > { %v2937_v37 = vpop.f32.mrf.mxu0 }
 0x808   : > { %v1426_v38 = vadd.f32 %v1423_v36, %v3505_v34 }
 0x80a   : > { %3235 = vtanh.f32 %v1426_v38 }
 0x817   : > { %v3236_v39 = vpop.eup %3235 }
 0x818   : > { %1500 = vst [vmem:[#allocation2] sm:$0xff] %v3236_v39  ;;  %2976 = vmatmul.mubr.f32.vlgmr.msra.gmra.mxu1 %v3236_v39 }
 0x8d7   : > { %1504 = sbr.rel (%p2297_p0) target bundleno = 2269 (0x8dd), region = 92 }
 0x8d8   : > { %v1494_v40 = vpop.f32.mrf.mxu1 }
 0x8d9   : > { %v1495_v41 = vadd.f32 %v1494_v40, %v3510_v35 }
 0x8da   : > { %v2977_v42 = vpop.f32.mrf.mxu1 }
 0x8db   : > { %2296 = vst [vmem:[%s3332_s15 + $0x20] sm:$0xff] %v1495_v41 }
 0x8dc   : > { %1505 = vst [vmem:[%s4192_s8] sm:$0xff] %v3236_v39 }
 0x8dd PF: > { %s1506_s10 = sadd.s32 5, %s3320_s29 }
 0x8de   : > { %p2298_p1 = scmp.ge.s32.totalorder %s1506_s10, 20 }
 0x8df   : > { %p2302_p2 = scmp.ne.s32.totalorder (!%p2298_p1), %s1506_s10, 19 }
 0x8e0   : > { %1510 = sbr.rel (%p2298_p1) target bundleno = 2718 (0xa9e), region = 96 }
 0x8e5   : > { %v3261_v43 = vmov 0.0   ;;  %v2299_v44 = vld [vmem:[%s3327_s12 + $0x28] sm:$0xff]  ;;  %vm1584_vm10 = vcmask 64512   ;;  %vm3262_vm11 = vmmov 0   ;;  %v1511_v45 = vld [vmem:[#allocation2] sm:$0xff] }
 0x8e6   : > { %2978 = vmatprep.subr.mxu0 %v3261_v43  ;;  %3013 = vmatprep.subr.mxu1 %v3261_v43 }
 0x8e7   : > { %2979 = vmatpush3.msra.mxu0 %v3420_v17  ;;  %3014 = vmatpush3.msra.mxu1 %v3340_v1 }
 0x8e8   : > { %2980 = vmatprep.subr.mxu0 %v3261_v43  ;;  %3015 = vmatprep.mubr.msk.f32.mxu1 %vm3262_vm11, %v3261_v43 }
 0x8e9   : > { %2981 = vmatpush3.msra.mxu0 %v3415_v16  ;;  %3016 = vmatmul.mubr.msk.f32.vlgmr.msra.gmra.mxu1 %vm1584_vm10, %v2299_v44 }
 0x8ea   : > { %2982 = vmatprep.subr.mxu0 %v3261_v43  ;;  %3010 = vmatprep.mubr.msk.f32.mxu0 %vm3262_vm11, %v3261_v43 }
 0x8eb   : > { %2983 = vmatpush3.msra.mxu0 %v3410_v15  ;;  %3018 = vmatprep.subr.mxu1 %v3261_v43 }
 0x8ec   : > { %2984 = vmatprep.subr.mxu0 %v3261_v43  ;;  %3019 = vmatpush3.msra.mxu1 %v3500_v33 }
 0x8ed   : > { %2985 = vmatpush3.msra.mxu0 %v3405_v14  ;;  %3020 = vmatprep.subr.mxu1 %v3261_v43 }
 0x8ee   : > { %2986 = vmatprep.subr.mxu0 %v3261_v43  ;;  %3021 = vmatpush3.msra.mxu1 %v3495_v32 }
 0x8ef   : > { %2987 = vmatpush3.msra.mxu0 %v3400_v13  ;;  %3022 = vmatprep.subr.mxu1 %v3261_v43 }
 0x8f0   : > { %2988 = vmatprep.subr.mxu0 %v3261_v43  ;;  %3023 = vmatpush3.msra.mxu1 %v3490_v31 }
 0x8f1   : > { %2989 = vmatpush3.msra.mxu0 %v3395_v12  ;;  %3024 = vmatprep.subr.mxu1 %v3261_v43 }
 0x8f2   : > { %2990 = vmatprep.subr.mxu0 %v3261_v43  ;;  %3025 = vmatpush3.msra.mxu1 %v3485_v30 }
 0x8f3   : > { %2991 = vmatpush3.msra.mxu0 %v3390_v11  ;;  %3026 = vmatprep.subr.mxu1 %v3261_v43 }
 0x8f4   : > { %2992 = vmatprep.subr.mxu0 %v3261_v43  ;;  %3027 = vmatpush3.msra.mxu1 %v3480_v29 }
 0x8f5   : > { %2993 = vmatpush3.msra.mxu0 %v3385_v10  ;;  %3028 = vmatprep.subr.mxu1 %v3261_v43 }
 0x8f6   : > { %2994 = vmatprep.subr.mxu0 %v3261_v43  ;;  %3029 = vmatpush3.msra.mxu1 %v3475_v28 }
 0x8f7   : > { %2995 = vmatpush3.msra.mxu0 %v3380_v9  ;;  %3030 = vmatprep.subr.mxu1 %v3261_v43 }
 0x8f8   : > { %2996 = vmatprep.subr.mxu0 %v3261_v43  ;;  %3031 = vmatpush3.msra.mxu1 %v3470_v27 }
 0x8f9   : > { %2997 = vmatpush3.msra.mxu0 %v3375_v8  ;;  %3032 = vmatprep.subr.mxu1 %v3261_v43 }
 0x8fa   : > { %2998 = vmatprep.subr.mxu0 %v3261_v43  ;;  %3033 = vmatpush3.msra.mxu1 %v3465_v26 }
 0x8fb   : > { %2999 = vmatpush3.msra.mxu0 %v3370_v7  ;;  %3034 = vmatprep.subr.mxu1 %v3261_v43 }
 0x8fc   : > { %3000 = vmatprep.subr.mxu0 %v3261_v43  ;;  %3035 = vmatpush3.msra.mxu1 %v3460_v25 }
 0x8fd   : > { %3001 = vmatpush3.msra.mxu0 %v3365_v6  ;;  %3036 = vmatprep.subr.mxu1 %v3261_v43 }
 0x8fe   : > { %3002 = vmatprep.subr.mxu0 %v3261_v43  ;;  %3037 = vmatpush3.msra.mxu1 %v3455_v24 }
 0x8ff   : > { %3003 = vmatpush3.msra.mxu0 %v3360_v5  ;;  %3038 = vmatprep.subr.mxu1 %v3261_v43 }
 0x900   : > { %3004 = vmatprep.subr.mxu0 %v3261_v43  ;;  %3039 = vmatpush3.msra.mxu1 %v3450_v23 }
 0x901   : > { %3005 = vmatpush3.msra.mxu0 %v3355_v4  ;;  %3040 = vmatprep.subr.mxu1 %v3261_v43 }
 0x902   : > { %3006 = vmatprep.subr.mxu0 %v3261_v43  ;;  %3041 = vmatpush3.msra.mxu1 %v3445_v22 }
 0x903   : > { %3007 = vmatpush3.msra.mxu0 %v3350_v3  ;;  %3042 = vmatprep.subr.mxu1 %v3261_v43 }
 0x904   : > { %3008 = vmatprep.subr.mxu0 %v3261_v43  ;;  %3043 = vmatpush3.msra.mxu1 %v3440_v21 }
 0x905   : > { %3009 = vmatpush3.msra.mxu0 %v3345_v2  ;;  %3044 = vmatprep.subr.mxu1 %v3261_v43 }
 0x906   : > { %3011 = vmatmul.mubr.f32.vlgmr.msra.gmra.mxu0 %v1511_v45  ;;  %3045 = vmatpush3.msra.mxu1 %v3435_v20 }
 0x907   : > { %3046 = vmatprep.subr.mxu1 %v3261_v43  ;;  %3050 = vmatprep.mubr.msk.f32.mxu1 %vm3262_vm11, %v3261_v43 }
 0x908   : > { %3047 = vmatpush3.msra.mxu1 %v3430_v19 }
 0x909   : > { %3048 = vmatprep.subr.mxu1 %v3261_v43 }
 0x90a   : > { %3049 = vmatpush3.msra.mxu1 %v3425_v18 }
 0x9a9   : > { %v1654_v46 = vpop.f32.mrf.mxu1 }
 0x9ab   : > { %v3017_v47 = vpop.f32.mrf.mxu1 }
 0x9c6   : > { %v1580_v48 = vpop.f32.mrf.mxu0 }
 0x9c7   : > { %v1655_v49 = vadd.f32 %v1654_v46, %v1580_v48 }
 0x9c8   : > { %v3012_v50 = vpop.f32.mrf.mxu0 }
 0x9c9   : > { %v1658_v51 = vadd.f32 %v1655_v49, %v3505_v34 }
 0x9cb   : > { %3237 = vtanh.f32 %v1658_v51 }
 0x9d8   : > { %v3238_v52 = vpop.eup %3237 }
 0x9d9   : > { %1732 = vst [vmem:[#allocation2] sm:$0xff] %v3238_v52  ;;  %3051 = vmatmul.mubr.f32.vlgmr.msra.gmra.mxu1 %v3238_v52 }
 0xa98   : > { %1736 = sbr.rel (%p2302_p2) target bundleno = 2718 (0xa9e), region = 100 }
 0xa99   : > { %v1726_v53 = vpop.f32.mrf.mxu1 }
 0xa9a   : > { %v1727_v54 = vadd.f32 %v1726_v53, %v3510_v35 }
 0xa9b   : > { %v3052_v55 = vpop.f32.mrf.mxu1 }
 0xa9c   : > { %2301 = vst [vmem:[%s3332_s15 + $0x28] sm:$0xff] %v1727_v54 }
 0xa9d   : > { %1737 = vst [vmem:[%s4192_s8] sm:$0xff] %v3238_v52 }
 0xa9e PF: > { %s1738_s14 = sadd.s32 6, %s3320_s29 }
 0xa9f   : > { %p2303_p3 = scmp.ge.s32.totalorder %s1738_s14, 20 }
 0xaa0   : > { %p2307_p4 = scmp.ne.s32.totalorder (!%p2303_p3), %s1738_s14, 19 }
 0xaa1   : > { %1742 = sbr.rel (%p2303_p3) target bundleno = 3167 (0xc5f), region = 104 }
 0xaa6   : > { %v3263_v56 = vmov 0.0   ;;  %v2304_v57 = vld [vmem:[%s3327_s12 + $0x30] sm:$0xff]  ;;  %vm1816_vm12 = vcmask 64512   ;;  %vm3264_vm13 = vmmov 0   ;;  %v1743_v58 = vld [vmem:[#allocation2] sm:$0xff] }
 0xaa7   : > { %3053 = vmatprep.subr.mxu0 %v3263_v56  ;;  %3088 = vmatprep.subr.mxu1 %v3263_v56 }
 0xaa8   : > { %3054 = vmatpush3.msra.mxu0 %v3420_v17  ;;  %3089 = vmatpush3.msra.mxu1 %v3340_v1 }
 0xaa9   : > { %3055 = vmatprep.subr.mxu0 %v3263_v56  ;;  %3090 = vmatprep.mubr.msk.f32.mxu1 %vm3264_vm13, %v3263_v56 }
 0xaaa   : > { %3056 = vmatpush3.msra.mxu0 %v3415_v16  ;;  %3091 = vmatmul.mubr.msk.f32.vlgmr.msra.gmra.mxu1 %vm1816_vm12, %v2304_v57 }
 0xaab   : > { %3057 = vmatprep.subr.mxu0 %v3263_v56  ;;  %3085 = vmatprep.mubr.msk.f32.mxu0 %vm3264_vm13, %v3263_v56 }
 0xaac   : > { %3058 = vmatpush3.msra.mxu0 %v3410_v15  ;;  %3093 = vmatprep.subr.mxu1 %v3263_v56 }
 0xaad   : > { %3059 = vmatprep.subr.mxu0 %v3263_v56  ;;  %3094 = vmatpush3.msra.mxu1 %v3500_v33 }
 0xaae   : > { %3060 = vmatpush3.msra.mxu0 %v3405_v14  ;;  %3095 = vmatprep.subr.mxu1 %v3263_v56 }
 0xaaf   : > { %3061 = vmatprep.subr.mxu0 %v3263_v56  ;;  %3096 = vmatpush3.msra.mxu1 %v3495_v32 }
 0xab0   : > { %3062 = vmatpush3.msra.mxu0 %v3400_v13  ;;  %3097 = vmatprep.subr.mxu1 %v3263_v56 }
 0xab1   : > { %3063 = vmatprep.subr.mxu0 %v3263_v56  ;;  %3098 = vmatpush3.msra.mxu1 %v3490_v31 }
 0xab2   : > { %3064 = vmatpush3.msra.mxu0 %v3395_v12  ;;  %3099 = vmatprep.subr.mxu1 %v3263_v56 }
 0xab3   : > { %3065 = vmatprep.subr.mxu0 %v3263_v56  ;;  %3100 = vmatpush3.msra.mxu1 %v3485_v30 }
 0xab4   : > { %3066 = vmatpush3.msra.mxu0 %v3390_v11  ;;  %3101 = vmatprep.subr.mxu1 %v3263_v56 }
 0xab5   : > { %3067 = vmatprep.subr.mxu0 %v3263_v56  ;;  %3102 = vmatpush3.msra.mxu1 %v3480_v29 }
 0xab6   : > { %3068 = vmatpush3.msra.mxu0 %v3385_v10  ;;  %3103 = vmatprep.subr.mxu1 %v3263_v56 }
 0xab7   : > { %3069 = vmatprep.subr.mxu0 %v3263_v56  ;;  %3104 = vmatpush3.msra.mxu1 %v3475_v28 }
 0xab8   : > { %3070 = vmatpush3.msra.mxu0 %v3380_v9  ;;  %3105 = vmatprep.subr.mxu1 %v3263_v56 }
 0xab9   : > { %3071 = vmatprep.subr.mxu0 %v3263_v56  ;;  %3106 = vmatpush3.msra.mxu1 %v3470_v27 }
 0xaba   : > { %3072 = vmatpush3.msra.mxu0 %v3375_v8  ;;  %3107 = vmatprep.subr.mxu1 %v3263_v56 }
 0xabb   : > { %3073 = vmatprep.subr.mxu0 %v3263_v56  ;;  %3108 = vmatpush3.msra.mxu1 %v3465_v26 }
 0xabc   : > { %3074 = vmatpush3.msra.mxu0 %v3370_v7  ;;  %3109 = vmatprep.subr.mxu1 %v3263_v56 }
 0xabd   : > { %3075 = vmatprep.subr.mxu0 %v3263_v56  ;;  %3110 = vmatpush3.msra.mxu1 %v3460_v25 }
 0xabe   : > { %3076 = vmatpush3.msra.mxu0 %v3365_v6  ;;  %3111 = vmatprep.subr.mxu1 %v3263_v56 }
 0xabf   : > { %3077 = vmatprep.subr.mxu0 %v3263_v56  ;;  %3112 = vmatpush3.msra.mxu1 %v3455_v24 }
 0xac0   : > { %3078 = vmatpush3.msra.mxu0 %v3360_v5  ;;  %3113 = vmatprep.subr.mxu1 %v3263_v56 }
 0xac1   : > { %3079 = vmatprep.subr.mxu0 %v3263_v56  ;;  %3114 = vmatpush3.msra.mxu1 %v3450_v23 }
 0xac2   : > { %3080 = vmatpush3.msra.mxu0 %v3355_v4  ;;  %3115 = vmatprep.subr.mxu1 %v3263_v56 }
 0xac3   : > { %3081 = vmatprep.subr.mxu0 %v3263_v56  ;;  %3116 = vmatpush3.msra.mxu1 %v3445_v22 }
 0xac4   : > { %3082 = vmatpush3.msra.mxu0 %v3350_v3  ;;  %3117 = vmatprep.subr.mxu1 %v3263_v56 }
 0xac5   : > { %3083 = vmatprep.subr.mxu0 %v3263_v56  ;;  %3118 = vmatpush3.msra.mxu1 %v3440_v21 }
 0xac6   : > { %3084 = vmatpush3.msra.mxu0 %v3345_v2  ;;  %3119 = vmatprep.subr.mxu1 %v3263_v56 }
 0xac7   : > { %3086 = vmatmul.mubr.f32.vlgmr.msra.gmra.mxu0 %v1743_v58  ;;  %3120 = vmatpush3.msra.mxu1 %v3435_v20 }
 0xac8   : > { %3121 = vmatprep.subr.mxu1 %v3263_v56  ;;  %3125 = vmatprep.mubr.msk.f32.mxu1 %vm3264_vm13, %v3263_v56 }
 0xac9   : > { %3122 = vmatpush3.msra.mxu1 %v3430_v19 }
 0xaca   : > { %3123 = vmatprep.subr.mxu1 %v3263_v56 }
 0xacb   : > { %3124 = vmatpush3.msra.mxu1 %v3425_v18 }
 0xb6a   : > { %v1886_v59 = vpop.f32.mrf.mxu1 }
 0xb6c   : > { %v3092_v60 = vpop.f32.mrf.mxu1 }
 0xb87   : > { %v1812_v61 = vpop.f32.mrf.mxu0 }
 0xb88   : > { %v1887_v62 = vadd.f32 %v1886_v59, %v1812_v61 }
 0xb89   : > { %v3087_v63 = vpop.f32.mrf.mxu0 }
 0xb8a   : > { %v1890_v0 = vadd.f32 %v1887_v62, %v3505_v34 }
 0xb8c   : > { %3239 = vtanh.f32 %v1890_v0 }
 0xb99   : > { %v3240_v36 = vpop.eup %3239 }
 0xb9a   : > { %1964 = vst [vmem:[#allocation2] sm:$0xff] %v3240_v36  ;;  %3126 = vmatmul.mubr.f32.vlgmr.msra.gmra.mxu1 %v3240_v36 }
 0xc59   : > { %1968 = sbr.rel (%p2307_p4) target bundleno = 3167 (0xc5f), region = 108 }
 0xc5a   : > { %v1958_v37 = vpop.f32.mrf.mxu1 }
 0xc5b   : > { %v1959_v38 = vadd.f32 %v1958_v37, %v3510_v35 }
 0xc5c   : > { %v3127_v39 = vpop.f32.mrf.mxu1 }
 0xc5d   : > { %2306 = vst [vmem:[%s3332_s15 + $0x30] sm:$0xff] %v1959_v38 }
 0xc5e   : > { %1969 = vst [vmem:[%s4192_s8] sm:$0xff] %v3240_v36 }
 0xc5f PF: > { %s1970_s18 = sadd.s32 7, %s3320_s29 }
 0xc60   : > { %p2308_p5 = scmp.ge.s32.totalorder %s1970_s18, 20 }
 0xc61   : > { %p2312_p6 = scmp.ne.s32.totalorder (!%p2308_p5), %s1970_s18, 19 }
 0xc62   : > { %1974 = sbr.rel (%p2308_p5) target bundleno = 3616 (0xe20), region = 112 }
 0xc67   : > { %v3265_v40 = vmov 0.0   ;;  %v2309_v41 = vld [vmem:[%s3327_s12 + $0x38] sm:$0xff]  ;;  %vm2048_vm14 = vcmask 64512   ;;  %vm3266_vm15 = vmmov 0  }
 0xc68   : > { %3128 = vmatprep.subr.mxu0 %v3265_v40  ;;  %3163 = vmatprep.subr.mxu1 %v3265_v40 }
 0xc69   : > { %3129 = vmatpush3.msra.mxu0 %v3420_v17  ;;  %3164 = vmatpush3.msra.mxu1 %v3340_v1  ;;  %v1975_v1 = vld [vmem:[#allocation2] sm:$0xff] }
 0xc6a   : > { %3130 = vmatprep.subr.mxu0 %v3265_v40  ;;  %3165 = vmatprep.mubr.msk.f32.mxu1 %vm3266_vm15, %v3265_v40 }
 0xc6b   : > { %3131 = vmatpush3.msra.mxu0 %v3415_v16  ;;  %3166 = vmatmul.mubr.msk.f32.vlgmr.msra.gmra.mxu1 %vm2048_vm14, %v2309_v41 }
 0xc6c   : > { %3132 = vmatprep.subr.mxu0 %v3265_v40  ;;  %3160 = vmatprep.mubr.msk.f32.mxu0 %vm3266_vm15, %v3265_v40 }
 0xc6d   : > { %3133 = vmatpush3.msra.mxu0 %v3410_v15  ;;  %3168 = vmatprep.subr.mxu1 %v3265_v40 }
 0xc6e   : > { %3134 = vmatprep.subr.mxu0 %v3265_v40  ;;  %3169 = vmatpush3.msra.mxu1 %v3500_v33 }
 0xc6f   : > { %3135 = vmatpush3.msra.mxu0 %v3405_v14  ;;  %3170 = vmatprep.subr.mxu1 %v3265_v40 }
 0xc70   : > { %3136 = vmatprep.subr.mxu0 %v3265_v40  ;;  %3171 = vmatpush3.msra.mxu1 %v3495_v32 }
 0xc71   : > { %3137 = vmatpush3.msra.mxu0 %v3400_v13  ;;  %3172 = vmatprep.subr.mxu1 %v3265_v40 }
 0xc72   : > { %3138 = vmatprep.subr.mxu0 %v3265_v40  ;;  %3173 = vmatpush3.msra.mxu1 %v3490_v31 }
 0xc73   : > { %3139 = vmatpush3.msra.mxu0 %v3395_v12  ;;  %3174 = vmatprep.subr.mxu1 %v3265_v40 }
 0xc74   : > { %3140 = vmatprep.subr.mxu0 %v3265_v40  ;;  %3175 = vmatpush3.msra.mxu1 %v3485_v30 }
 0xc75   : > { %3141 = vmatpush3.msra.mxu0 %v3390_v11  ;;  %3176 = vmatprep.subr.mxu1 %v3265_v40 }
 0xc76   : > { %3142 = vmatprep.subr.mxu0 %v3265_v40  ;;  %3177 = vmatpush3.msra.mxu1 %v3480_v29 }
 0xc77   : > { %3143 = vmatpush3.msra.mxu0 %v3385_v10  ;;  %3178 = vmatprep.subr.mxu1 %v3265_v40 }
 0xc78   : > { %3144 = vmatprep.subr.mxu0 %v3265_v40  ;;  %3179 = vmatpush3.msra.mxu1 %v3475_v28 }
 0xc79   : > { %3145 = vmatpush3.msra.mxu0 %v3380_v9  ;;  %3180 = vmatprep.subr.mxu1 %v3265_v40 }
 0xc7a   : > { %3146 = vmatprep.subr.mxu0 %v3265_v40  ;;  %3181 = vmatpush3.msra.mxu1 %v3470_v27 }
 0xc7b   : > { %3147 = vmatpush3.msra.mxu0 %v3375_v8  ;;  %3182 = vmatprep.subr.mxu1 %v3265_v40 }
 0xc7c   : > { %3148 = vmatprep.subr.mxu0 %v3265_v40  ;;  %3183 = vmatpush3.msra.mxu1 %v3465_v26 }
 0xc7d   : > { %3149 = vmatpush3.msra.mxu0 %v3370_v7  ;;  %3184 = vmatprep.subr.mxu1 %v3265_v40 }
 0xc7e   : > { %3150 = vmatprep.subr.mxu0 %v3265_v40  ;;  %3185 = vmatpush3.msra.mxu1 %v3460_v25 }
 0xc7f   : > { %3151 = vmatpush3.msra.mxu0 %v3365_v6  ;;  %3186 = vmatprep.subr.mxu1 %v3265_v40 }
 0xc80   : > { %3152 = vmatprep.subr.mxu0 %v3265_v40  ;;  %3187 = vmatpush3.msra.mxu1 %v3455_v24 }
 0xc81   : > { %3153 = vmatpush3.msra.mxu0 %v3360_v5  ;;  %3188 = vmatprep.subr.mxu1 %v3265_v40 }
 0xc82   : > { %3154 = vmatprep.subr.mxu0 %v3265_v40  ;;  %3189 = vmatpush3.msra.mxu1 %v3450_v23 }
 0xc83   : > { %3155 = vmatpush3.msra.mxu0 %v3355_v4  ;;  %3190 = vmatprep.subr.mxu1 %v3265_v40 }
 0xc84   : > { %3156 = vmatprep.subr.mxu0 %v3265_v40  ;;  %3191 = vmatpush3.msra.mxu1 %v3445_v22 }
 0xc85   : > { %3157 = vmatpush3.msra.mxu0 %v3350_v3  ;;  %3192 = vmatprep.subr.mxu1 %v3265_v40 }
 0xc86   : > { %3158 = vmatprep.subr.mxu0 %v3265_v40  ;;  %3193 = vmatpush3.msra.mxu1 %v3440_v21 }
 0xc87   : > { %3159 = vmatpush3.msra.mxu0 %v3345_v2  ;;  %3194 = vmatprep.subr.mxu1 %v3265_v40 }
 0xc88   : > { %3161 = vmatmul.mubr.f32.vlgmr.msra.gmra.mxu0 %v1975_v1  ;;  %3195 = vmatpush3.msra.mxu1 %v3435_v20 }
 0xc89   : > { %3196 = vmatprep.subr.mxu1 %v3265_v40  ;;  %3200 = vmatprep.mubr.msk.f32.mxu1 %vm3266_vm15, %v3265_v40 }
 0xc8a   : > { %3197 = vmatpush3.msra.mxu1 %v3430_v19 }
 0xc8b   : > { %3198 = vmatprep.subr.mxu1 %v3265_v40 }
 0xc8c   : > { %3199 = vmatpush3.msra.mxu1 %v3425_v18 }
 0xd2b   : > { %v2118_v3 = vpop.f32.mrf.mxu1 }
 0xd2d   : > { %v3167_v4 = vpop.f32.mrf.mxu1 }
 0xd48   : > { %v2044_v2 = vpop.f32.mrf.mxu0 }
 0xd49   : > { %v2119_v5 = vadd.f32 %v2118_v3, %v2044_v2 }
 0xd4a   : > { %v3162_v6 = vpop.f32.mrf.mxu0 }
 0xd4b   : > { %v2122_v7 = vadd.f32 %v2119_v5, %v3505_v34 }
 0xd4d   : > { %3241 = vtanh.f32 %v2122_v7 }
 0xd5a   : > { %v3242_v8 = vpop.eup %3241 }
 0xd5b   : > { %2196 = vst [vmem:[#allocation2] sm:$0xff] %v3242_v8  ;;  %3201 = vmatmul.mubr.f32.vlgmr.msra.gmra.mxu1 %v3242_v8 }
 0xe1a   : > { %2200 = sbr.rel (%p2312_p6) target bundleno = 3616 (0xe20), region = 116 }
 0xe1b   : > { %v2190_v9 = vpop.f32.mrf.mxu1 }
 0xe1c   : > { %v2191_v10 = vadd.f32 %v2190_v9, %v3510_v35 }
 0xe1d   : > { %v3202_v11 = vpop.f32.mrf.mxu1 }
 0xe1e   : > { %2311 = vst [vmem:[%s3332_s15 + $0x38] sm:$0xff] %v2191_v10 }
 0xe1f   : > { %2201 = vst [vmem:[%s4192_s8] sm:$0xff] %v3242_v8 }
 0xe20 PF: > { %s19_s27 = sadd.s32 1, %s3249_s27  }
 0xe21   : > { %p16_p7 = scmp.ge.s32.totalorder %s19_s27, 5  }
 0xe23   :  { %18 = sbr.rel (!%p16_p7) target bundleno = 1 (0x1), region = 168 }

</bundles_post_ra>
